<compile_context>
chip_gen: v6e
topology: v6e:2x2x1
jax: 0.10.0
libtpu: 0.0.40
codegen_flags: <defaults>
</compile_context>

<pallas_src>
import math
import jax
import jax.numpy as jnp
from jax.experimental import pallas as pl
from jax.experimental.pallas import tpu as pltpu

# ----------------------------- config (small ViT) -----------------------------
IMAGE_SIZE   = 16
PATCH_SIZE   = 4
NUM_CHANNELS = 3
HIDDEN       = 32
NUM_HEADS    = 2
HEAD_DIM     = HIDDEN // NUM_HEADS
INTERMEDIATE = 64
NUM_LAYERS   = 2
NUM_LABELS   = 10
LN_EPS       = 1e-12

NUM_PATCHES = (IMAGE_SIZE // PATCH_SIZE) ** 2          # 16
SEQ         = NUM_PATCHES + 1                          # 17 (CLS + patches)
SEQ_PAD     = 24                                       # padded to 8-sublane multiple
PATCH_DIM   = NUM_CHANNELS * PATCH_SIZE * PATCH_SIZE   # 48
LOGITS_PAD  = 128                                      # lane-dense classifier output


# ----------------------------- in-kernel helpers ------------------------------
def _layernorm(v, w, b):
    mu = jnp.mean(v, axis=-1, keepdims=True)
    var = jnp.mean(jnp.square(v - mu), axis=-1, keepdims=True)
    return (v - mu) * jax.lax.rsqrt(var + LN_EPS) * w + b


def _gelu(x):
    # TODO(synk): HF ViT default hidden_act is exact erf-GELU; tanh approximation
    # used here for robust Mosaic lowering (difference ~1e-3 relative).
    c = math.sqrt(2.0 / math.pi)
    return 0.5 * x * (1.0 + jnp.tanh(c * (x + 0.044715 * x * x * x)))


# ----------------------------- fused Pallas kernel -----------------------------
def vit_kernel(patches_ref, w_patch_ref, base_ref,
               ln_p_ref, w_qkv_ref, b_qkv_ref, w_o_ref, b_o_ref,
               mlp_wi_ref, mlp_bi_ref, mlp_wo_ref, mlp_bo_ref,
               ln_f_ref, wc_ref, bc_ref,
               logits_ref):
    # ---- embedding: one matmul + one add ----
    # base already contains (cls + pos[0]) at row 0, (pos[1:] + patch_bias) at
    # rows 1..16, zeros on the pad rows; patches_ref rows 0 and 17.. are zero.
    x = jnp.dot(patches_ref[0], w_patch_ref[...],
                preferred_element_type=jnp.float32) + base_ref[...]   # (SEQ_PAD, H)

    # ---- hoisted additive key mask: pad key columns contribute -1e30 ----
    key_ids = jax.lax.broadcasted_iota(jnp.int32, (1, SEQ_PAD), 1)
    key_bias = jnp.where(key_ids < SEQ, 0.0, -1e30).astype(jnp.float32)  # (1, SEQ_PAD)

    scale = jnp.float32(1.0 / math.sqrt(HEAD_DIM))

    # ---- encoder layers (weights stay resident in VMEM) ----
    for l in range(NUM_LAYERS):                       # static unroll
        lnp = ln_p_ref[l]                             # (4, H): ln1_w, ln1_b, ln2_w, ln2_b

        # attention block (pre-LN), fused QKV projection
        h = _layernorm(x, lnp[0:1, :], lnp[1:2, :])
        qkv = jnp.dot(h, w_qkv_ref[l],
                      preferred_element_type=jnp.float32) + b_qkv_ref[l]   # (S, 3H)

        ctx_heads = []
        for hh in range(NUM_HEADS):                   # static unroll, 16-lane slices
            lo = hh * HEAD_DIM
            qh = qkv[:, lo:lo + HEAD_DIM]
            kh = qkv[:, HIDDEN + lo:HIDDEN + lo + HEAD_DIM]
            vh = qkv[:, 2 * HIDDEN + lo:2 * HIDDEN + lo + HEAD_DIM]
            s = jax.lax.dot_general(qh, kh, (((1,), (1,)), ((), ())),
                                    preferred_element_type=jnp.float32) * scale + key_bias
            s = s - jnp.max(s, axis=-1, keepdims=True)
            p = jnp.exp(s)
            p = p * pl.reciprocal(jnp.sum(p, axis=-1, keepdims=True), approx=True)
            ctx_heads.append(jnp.dot(p, vh, preferred_element_type=jnp.float32))
        ctx = jnp.concatenate(ctx_heads, axis=-1)     # (S, H)
        x = x + jnp.dot(ctx, w_o_ref[l],
                        preferred_element_type=jnp.float32) + b_o_ref[l]   # residual 1

        # MLP block (pre-LN)
        h2 = _layernorm(x, lnp[2:3, :], lnp[3:4, :])
        inter = _gelu(jnp.dot(h2, mlp_wi_ref[l],
                              preferred_element_type=jnp.float32) + mlp_bi_ref[l])
        x = x + jnp.dot(inter, mlp_wo_ref[l],
                        preferred_element_type=jnp.float32) + mlp_bo_ref[l]

    # ---- final LN on CLS row (row 0, sublane-aligned), lane-dense head ----
    ln_f = ln_f_ref[...]                              # (2, H)
    hcls = _layernorm(x[0:1, :], ln_f[0:1, :], ln_f[1:2, :])
    logits = jnp.dot(hcls, wc_ref[...],
                     preferred_element_type=jnp.float32) + bc_ref[...]     # (1, 128)
    logits_ref[...] = logits.reshape(1, 1, LOGITS_PAD)


# ----------------------------- wrappers ---------------------------------------
def extract_patches(pixels):
    # NCHW -> (B, NUM_PATCHES, C*P*P), flatten order (c, ph, pw) to match
    # nn.Conv2d weight layout (out, c, ph, pw).
    B, C, H, W = pixels.shape
    P = PATCH_SIZE
    x = pixels.reshape(B, C, H // P, P, W // P, P)
    x = x.transpose(0, 2, 4, 1, 3, 5)                 # (B, gh, gw, C, P, P)
    return x.reshape(B, NUM_PATCHES, C * P * P)


def pack_params(params):
    L = params["layers"]

    def stk(fn):
        return jnp.stack([fn(lp) for lp in L], axis=0)

    # cls token, position embedding and patch-projection bias folded into one addend
    base = jnp.concatenate([
        params["cls"] + params["pos"][0:1, :],
        params["pos"][1:, :] + params["b_patch"],
        jnp.zeros((SEQ_PAD - SEQ, HIDDEN), jnp.float32)], axis=0)          # (SEQ_PAD, H)

    wc_pad = jnp.zeros((HIDDEN, LOGITS_PAD), jnp.float32).at[:, :NUM_LABELS].set(params["wc"])
    bc_pad = jnp.zeros((1, LOGITS_PAD), jnp.float32).at[:, :NUM_LABELS].set(params["bc"])

    return {
        "base":   base,
        "ln_p":   stk(lambda lp: jnp.concatenate(
            [lp["ln1_w"], lp["ln1_b"], lp["ln2_w"], lp["ln2_b"]], axis=0)),  # (L, 4, H)
        "w_qkv":  stk(lambda lp: jnp.concatenate(
            [lp["wq"], lp["wk"], lp["wv"]], axis=1)),                        # (L, H, 3H)
        "b_qkv":  stk(lambda lp: jnp.concatenate(
            [lp["bq"], lp["bk"], lp["bv"]], axis=1)),                        # (L, 1, 3H)
        "w_o":    stk(lambda lp: lp["wo"]),                                  # (L, H, H)
        "b_o":    stk(lambda lp: lp["bo"]),                                  # (L, 1, H)
        "mlp_wi": stk(lambda lp: lp["wi"]),                                  # (L, H, I)
        "mlp_bi": stk(lambda lp: lp["bi"]),                                  # (L, 1, I)
        "mlp_wo": stk(lambda lp: lp["wo2"]),                                 # (L, I, H)
        "mlp_bo": stk(lambda lp: lp["bo2"]),                                 # (L, 1, H)
        "ln_f":   jnp.concatenate([params["ln_f_w"], params["ln_f_b"]], axis=0),  # (2, H)
        "wc_pad": wc_pad,
        "bc_pad": bc_pad,
    }


def vit_forward(pixels, params):
    B = pixels.shape[0]
    patches = extract_patches(pixels)                                  # (B, 16, 48)
    # rows 0 (CLS) and 17..23 (pad) are zero so base addend handles them
    patches_pad = jnp.zeros((B, SEQ_PAD, PATCH_DIM), jnp.float32)
    patches_pad = patches_pad.at[:, 1:1 + NUM_PATCHES, :].set(patches)

    pk = pack_params(params)
    args = (patches_pad, params["w_patch"], pk["base"],
            pk["ln_p"], pk["w_qkv"], pk["b_qkv"], pk["w_o"], pk["b_o"],
            pk["mlp_wi"], pk["mlp_bi"], pk["mlp_wo"], pk["mlp_bo"],
            pk["ln_f"], pk["wc_pad"], pk["bc_pad"])

    def full(a):  # whole-array block, constant index_map -> VMEM-resident across grid
        return pl.BlockSpec(a.shape, lambda b, _nd=a.ndim: (0,) * _nd)

    in_specs = [pl.BlockSpec((1, SEQ_PAD, PATCH_DIM), lambda b: (b, 0, 0))] + \
               [full(a) for a in args[1:]]

    out = pl.pallas_call(
        vit_kernel,
        grid=(B,),
        out_shape=jax.ShapeDtypeStruct((B, 1, LOGITS_PAD), jnp.float32),
        in_specs=in_specs,
        out_specs=pl.BlockSpec((1, 1, LOGITS_PAD), lambda b: (b, 0, 0)),
        compiler_params=pltpu.CompilerParams(dimension_semantics=("parallel",)),
    )(*args)
    return out[:, 0, :NUM_LABELS]


# ----------------------------- pure-JAX reference -----------------------------
def vit_reference(pixels, params):
    patches = extract_patches(pixels)
    x = jnp.einsum("bnk,kh->bnh", patches, params["w_patch"]) + params["b_patch"]
    cls = jnp.broadcast_to(params["cls"][None], (pixels.shape[0], 1, HIDDEN))
    x = jnp.concatenate([cls, x], axis=1) + params["pos"][None]
    for lp in params["layers"]:
        h = _layernorm(x, lp["ln1_w"], lp["ln1_b"])
        q = h @ lp["wq"] + lp["bq"]
        k = h @ lp["wk"] + lp["bk"]
        v = h @ lp["wv"] + lp["bv"]
        qh = q.reshape(-1, SEQ, NUM_HEADS, HEAD_DIM).transpose(0, 2, 1, 3)
        kh = k.reshape(-1, SEQ, NUM_HEADS, HEAD_DIM).transpose(0, 2, 1, 3)
        vh = v.reshape(-1, SEQ, NUM_HEADS, HEAD_DIM).transpose(0, 2, 1, 3)
        s = jnp.einsum("bhqd,bhkd->bhqk", qh, kh) / math.sqrt(HEAD_DIM)
        p = jax.nn.softmax(s, axis=-1)
        ctx = jnp.einsum("bhqk,bhkd->bhqd", p, vh).transpose(0, 2, 1, 3)
        ctx = ctx.reshape(-1, SEQ, HIDDEN)
        x = x + (ctx @ lp["wo"] + lp["bo"])
        h2 = _layernorm(x, lp["ln2_w"], lp["ln2_b"])
        x = x + (_gelu(h2 @ lp["wi"] + lp["bi"]) @ lp["wo2"] + lp["bo2"])
    h = _layernorm(x, params["ln_f_w"], params["ln_f_b"])
    return h[:, 0, :] @ params["wc"] + params["bc"]


# ----------------------------- deterministic init -----------------------------
def init_params(key):
    keys = iter(jax.random.split(key, 16 + NUM_LAYERS * 24))

    def nrm(shape, std=0.02):
        return std * jax.random.normal(next(keys), shape, jnp.float32)

    p = {
        "w_patch": nrm((PATCH_DIM, HIDDEN)),          # conv kernel flattened (c,ph,pw)
        "b_patch": nrm((1, HIDDEN)),
        "cls":     nrm((1, HIDDEN)),
        "pos":     nrm((SEQ, HIDDEN)),
        "ln_f_w":  1.0 + nrm((1, HIDDEN), std=0.1),
        "ln_f_b":  nrm((1, HIDDEN)),
        "wc":      nrm((HIDDEN, NUM_LABELS)),
        "bc":      nrm((1, NUM_LABELS)),
        "layers":  [],
    }
    for _ in range(NUM_LAYERS):
        p["layers"].append({
            "ln1_w": 1.0 + nrm((1, HIDDEN), std=0.1),
            "ln1_b": nrm((1, HIDDEN)),
            "wq": nrm((HIDDEN, HIDDEN)), "bq": nrm((1, HIDDEN)),
            "wk": nrm((HIDDEN, HIDDEN)), "bk": nrm((1, HIDDEN)),
            "wv": nrm((HIDDEN, HIDDEN)), "bv": nrm((1, HIDDEN)),
            "wo": nrm((HIDDEN, HIDDEN)), "bo": nrm((1, HIDDEN)),
            "ln2_w": 1.0 + nrm((1, HIDDEN), std=0.1),
            "ln2_b": nrm((1, HIDDEN)),
            "wi": nrm((HIDDEN, INTERMEDIATE)), "bi": nrm((1, INTERMEDIATE)),
            "wo2": nrm((INTERMEDIATE, HIDDEN)), "bo2": nrm((1, HIDDEN)),
        })
    return p


# ----------------------------- main --------------------------------------------
if __name__ == "__main__":
    key = jax.random.PRNGKey(0)
    k_pix, k_par = jax.random.split(key)
    pixel_values = jax.random.normal(
        k_pix, (2, NUM_CHANNELS, IMAGE_SIZE, IMAGE_SIZE), jnp.float32)
    params = init_params(k_par)

    logits = vit_forward(pixel_values, params)
    logits = jax.block_until_ready(logits)
    assert logits.shape == (2, NUM_LABELS)

    ref = vit_reference(pixel_values, params)
    assert jnp.allclose(logits, ref, atol=2e-3, rtol=2e-3), (logits, ref)

    print("KERNEL_OK")
</pallas_src>

<mosaic_0001>
module attributes {stable_mosaic.version = 11 : i64} {
  func.func @vit_kernel(%arg0: i32, %arg1: memref<1x24x48xf32, #tpu.memory_space<vmem>>, %arg2: memref<48x32xf32, #tpu.memory_space<vmem>>, %arg3: memref<24x32xf32, #tpu.memory_space<vmem>>, %arg4: memref<2x4x32xf32, #tpu.memory_space<vmem>>, %arg5: memref<2x32x96xf32, #tpu.memory_space<vmem>>, %arg6: memref<2x1x96xf32, #tpu.memory_space<vmem>>, %arg7: memref<2x32x32xf32, #tpu.memory_space<vmem>>, %arg8: memref<2x1x32xf32, #tpu.memory_space<vmem>>, %arg9: memref<2x32x64xf32, #tpu.memory_space<vmem>>, %arg10: memref<2x1x64xf32, #tpu.memory_space<vmem>>, %arg11: memref<2x64x32xf32, #tpu.memory_space<vmem>>, %arg12: memref<2x1x32xf32, #tpu.memory_space<vmem>>, %arg13: memref<2x32xf32, #tpu.memory_space<vmem>>, %arg14: memref<32x128xf32, #tpu.memory_space<vmem>>, %arg15: memref<1x128xf32, #tpu.memory_space<vmem>>, %arg16: memref<1x1x128xf32, #tpu.memory_space<vmem>>) attributes {dimension_semantics = [#tpu.dimension_semantics<parallel>], iteration_bounds = array<i64: 2>, scalar_prefetch = 0 : i64, scratch_operands = 0 : i64, tpu.core_type = #tpu.core_type<tc>, window_params = [{transform_indices = @transform_0, window_bounds = array<i64: 1, 24, 48>}, {pipeline_mode = #tpu.pipeline_mode<synchronous>, transform_indices = @transform_1, window_bounds = array<i64: 48, 32>}, {pipeline_mode = #tpu.pipeline_mode<synchronous>, transform_indices = @transform_2, window_bounds = array<i64: 24, 32>}, {pipeline_mode = #tpu.pipeline_mode<synchronous>, transform_indices = @transform_3, window_bounds = array<i64: 2, 4, 32>}, {pipeline_mode = #tpu.pipeline_mode<synchronous>, transform_indices = @transform_4, window_bounds = array<i64: 2, 32, 96>}, {pipeline_mode = #tpu.pipeline_mode<synchronous>, transform_indices = @transform_5, window_bounds = array<i64: 2, 1, 96>}, {pipeline_mode = #tpu.pipeline_mode<synchronous>, transform_indices = @transform_6, window_bounds = array<i64: 2, 32, 32>}, {pipeline_mode = #tpu.pipeline_mode<synchronous>, transform_indices = @transform_7, window_bounds = array<i64: 2, 1, 32>}, {pipeline_mode = #tpu.pipeline_mode<synchronous>, transform_indices = @transform_8, window_bounds = array<i64: 2, 32, 64>}, {pipeline_mode = #tpu.pipeline_mode<synchronous>, transform_indices = @transform_9, window_bounds = array<i64: 2, 1, 64>}, {pipeline_mode = #tpu.pipeline_mode<synchronous>, transform_indices = @transform_10, window_bounds = array<i64: 2, 64, 32>}, {pipeline_mode = #tpu.pipeline_mode<synchronous>, transform_indices = @transform_11, window_bounds = array<i64: 2, 1, 32>}, {pipeline_mode = #tpu.pipeline_mode<synchronous>, transform_indices = @transform_12, window_bounds = array<i64: 2, 32>}, {pipeline_mode = #tpu.pipeline_mode<synchronous>, transform_indices = @transform_13, window_bounds = array<i64: 32, 128>}, {pipeline_mode = #tpu.pipeline_mode<synchronous>, transform_indices = @transform_14, window_bounds = array<i64: 1, 128>}, {transform_indices = @transform_15, window_bounds = array<i64: 1, 1, 128>}]} {
    %c0 = arith.constant 0 : index
    %c0_0 = arith.constant 0 : index
    %c0_1 = arith.constant 0 : index
    %0 = vector.load %arg1[%c0, %c0_0, %c0_1] : memref<1x24x48xf32, #tpu.memory_space<vmem>>, vector<1x24x48xf32>
    %1 = vector.shape_cast %0 : vector<1x24x48xf32> to vector<24x48xf32>
    %c0_2 = arith.constant 0 : index
    %c0_3 = arith.constant 0 : index
    %2 = vector.load %arg2[%c0_2, %c0_3] : memref<48x32xf32, #tpu.memory_space<vmem>>, vector<48x32xf32>
    %cst = arith.constant dense<0.000000e+00> : vector<24x32xf32>
    %3 = tpu.matmul %1, %2, %cst {dimension_numbers = #tpu.dot_dimension_numbers<[1], [0], [0], [1], [0, 0, 1, 1], [], []>} : vector<24x48xf32>, vector<48x32xf32>, vector<24x32xf32> -> vector<24x32xf32>
    %c0_4 = arith.constant 0 : index
    %c0_5 = arith.constant 0 : index
    %4 = vector.load %arg3[%c0_4, %c0_5] : memref<24x32xf32, #tpu.memory_space<vmem>>, vector<24x32xf32>
    %5 = arith.addf %3, %4 : vector<24x32xf32>
    %6 = tpu.iota {dimensions = array<i32: 1>} : vector<1x24xi32>
    %c17_i32 = arith.constant 17 : i32
    %7 = vector.broadcast %c17_i32 : i32 to vector<1x24xi32>
    %8 = arith.cmpi slt, %6, %7 : vector<1x24xi32>
    %cst_6 = arith.constant 0.000000e+00 : f32
    %cst_7 = arith.constant -1.000000e+30 : f32
    %9 = vector.broadcast %cst_6 : f32 to vector<1x24xf32>
    %10 = vector.broadcast %cst_7 : f32 to vector<1x24xf32>
    %11 = arith.select %8, %9, %10 : vector<1x24xi1>, vector<1x24xf32>
    %c0_8 = arith.constant 0 : index
    %c0_9 = arith.constant 0 : index
    %c0_10 = arith.constant 0 : index
    %12 = vector.load %arg4[%c0_8, %c0_9, %c0_10] : memref<2x4x32xf32, #tpu.memory_space<vmem>>, vector<1x4x32xf32>
    %13 = vector.shape_cast %12 : vector<1x4x32xf32> to vector<4x32xf32>
    %14 = vector.extract_strided_slice %13 {offsets = [0, 0], sizes = [1, 32], strides = [1, 1]} : vector<4x32xf32> to vector<1x32xf32>
    %15 = vector.extract_strided_slice %13 {offsets = [1, 0], sizes = [1, 32], strides = [1, 1]} : vector<4x32xf32> to vector<1x32xf32>
    %cst_11 = arith.constant dense<0.000000e+00> : vector<24xf32>
    %16 = vector.multi_reduction <add>, %5, %cst_11 [1] : vector<24x32xf32> to vector<24xf32>
    %17 = vector.shape_cast %16 : vector<24xf32> to vector<24x1xf32>
    %cst_12 = arith.constant 3.200000e+01 : f32
    %18 = vector.broadcast %cst_12 : f32 to vector<24x1xf32>
    %19 = arith.divf %17, %18 : vector<24x1xf32>
    %20 = vector.broadcast %19 : vector<24x1xf32> to vector<24x32xf32>
    %21 = arith.subf %5, %20 : vector<24x32xf32>
    %22 = arith.mulf %21, %21 : vector<24x32xf32>
    %cst_13 = arith.constant dense<0.000000e+00> : vector<24xf32>
    %23 = vector.multi_reduction <add>, %22, %cst_13 [1] : vector<24x32xf32> to vector<24xf32>
    %24 = vector.shape_cast %23 : vector<24xf32> to vector<24x1xf32>
    %cst_14 = arith.constant 3.200000e+01 : f32
    %25 = vector.broadcast %cst_14 : f32 to vector<24x1xf32>
    %26 = arith.divf %24, %25 : vector<24x1xf32>
    %27 = vector.broadcast %19 : vector<24x1xf32> to vector<24x32xf32>
    %28 = arith.subf %5, %27 : vector<24x32xf32>
    %cst_15 = arith.constant 9.99999996E-13 : f32
    %29 = vector.broadcast %cst_15 : f32 to vector<24x1xf32>
    %30 = arith.addf %26, %29 : vector<24x1xf32>
    %31 = math.rsqrt %30 : vector<24x1xf32>
    %32 = vector.broadcast %31 : vector<24x1xf32> to vector<24x32xf32>
    %33 = arith.mulf %28, %32 : vector<24x32xf32>
    %34 = vector.broadcast %14 : vector<1x32xf32> to vector<24x32xf32>
    %35 = arith.mulf %33, %34 : vector<24x32xf32>
    %36 = vector.broadcast %15 : vector<1x32xf32> to vector<24x32xf32>
    %37 = arith.addf %35, %36 : vector<24x32xf32>
    %c0_16 = arith.constant 0 : index
    %c0_17 = arith.constant 0 : index
    %c0_18 = arith.constant 0 : index
    %38 = vector.load %arg5[%c0_16, %c0_17, %c0_18] : memref<2x32x96xf32, #tpu.memory_space<vmem>>, vector<1x32x96xf32>
    %39 = vector.shape_cast %38 : vector<1x32x96xf32> to vector<32x96xf32>
    %cst_19 = arith.constant dense<0.000000e+00> : vector<24x96xf32>
    %40 = tpu.matmul %37, %39, %cst_19 {dimension_numbers = #tpu.dot_dimension_numbers<[1], [0], [0], [1], [0, 0, 1, 1], [], []>} : vector<24x32xf32>, vector<32x96xf32>, vector<24x96xf32> -> vector<24x96xf32>
    %c0_20 = arith.constant 0 : index
    %c0_21 = arith.constant 0 : index
    %c0_22 = arith.constant 0 : index
    %41 = vector.load %arg6[%c0_20, %c0_21, %c0_22] : memref<2x1x96xf32, #tpu.memory_space<vmem>>, vector<1x1x96xf32>
    %42 = vector.shape_cast %41 : vector<1x1x96xf32> to vector<1x96xf32>
    %43 = vector.broadcast %42 : vector<1x96xf32> to vector<24x96xf32>
    %44 = arith.addf %40, %43 : vector<24x96xf32>
    %45 = vector.extract_strided_slice %44 {offsets = [0, 0], sizes = [24, 16], strides = [1, 1]} : vector<24x96xf32> to vector<24x16xf32>
    %46 = vector.extract_strided_slice %44 {offsets = [0, 32], sizes = [24, 16], strides = [1, 1]} : vector<24x96xf32> to vector<24x16xf32>
    %47 = vector.extract_strided_slice %44 {offsets = [0, 64], sizes = [24, 16], strides = [1, 1]} : vector<24x96xf32> to vector<24x16xf32>
    %cst_23 = arith.constant dense<0.000000e+00> : vector<24x24xf32>
    %48 = tpu.matmul %45, %46, %cst_23 {dimension_numbers = #tpu.dot_dimension_numbers<[1], [1], [0], [0], [0, 0, 1, 0], [], []>} : vector<24x16xf32>, vector<24x16xf32>, vector<24x24xf32> -> vector<24x24xf32>
    %cst_24 = arith.constant 2.500000e-01 : f32
    %49 = vector.broadcast %cst_24 : f32 to vector<24x24xf32>
    %50 = arith.mulf %48, %49 : vector<24x24xf32>
    %51 = vector.broadcast %11 : vector<1x24xf32> to vector<24x24xf32>
    %52 = arith.addf %50, %51 : vector<24x24xf32>
    %cst_25 = arith.constant dense<0xFF800000> : vector<24xf32>
    %53 = vector.multi_reduction <maximumf>, %52, %cst_25 [1] : vector<24x24xf32> to vector<24xf32>
    %54 = vector.shape_cast %53 : vector<24xf32> to vector<24x1xf32>
    %55 = vector.broadcast %54 : vector<24x1xf32> to vector<24x24xf32>
    %56 = arith.subf %52, %55 : vector<24x24xf32>
    %57 = math.exp %56 : vector<24x24xf32>
    %cst_26 = arith.constant dense<0.000000e+00> : vector<24xf32>
    %58 = vector.multi_reduction <add>, %57, %cst_26 [1] : vector<24x24xf32> to vector<24xf32>
    %59 = vector.shape_cast %58 : vector<24xf32> to vector<24x1xf32>
    %60 = tpu.reciprocal %59 {approx = true} : vector<24x1xf32> -> vector<24x1xf32>
    %61 = vector.broadcast %60 : vector<24x1xf32> to vector<24x24xf32>
    %62 = arith.mulf %57, %61 : vector<24x24xf32>
    %cst_27 = arith.constant dense<0.000000e+00> : vector<24x16xf32>
    %63 = tpu.matmul %62, %47, %cst_27 {dimension_numbers = #tpu.dot_dimension_numbers<[1], [0], [0], [1], [0, 0, 1, 1], [], []>} : vector<24x24xf32>, vector<24x16xf32>, vector<24x16xf32> -> vector<24x16xf32>
    %64 = vector.extract_strided_slice %44 {offsets = [0, 16], sizes = [24, 16], strides = [1, 1]} : vector<24x96xf32> to vector<24x16xf32>
    %65 = vector.extract_strided_slice %44 {offsets = [0, 48], sizes = [24, 16], strides = [1, 1]} : vector<24x96xf32> to vector<24x16xf32>
    %66 = vector.extract_strided_slice %44 {offsets = [0, 80], sizes = [24, 16], strides = [1, 1]} : vector<24x96xf32> to vector<24x16xf32>
    %cst_28 = arith.constant dense<0.000000e+00> : vector<24x24xf32>
    %67 = tpu.matmul %64, %65, %cst_28 {dimension_numbers = #tpu.dot_dimension_numbers<[1], [1], [0], [0], [0, 0, 1, 0], [], []>} : vector<24x16xf32>, vector<24x16xf32>, vector<24x24xf32> -> vector<24x24xf32>
    %cst_29 = arith.constant 2.500000e-01 : f32
    %68 = vector.broadcast %cst_29 : f32 to vector<24x24xf32>
    %69 = arith.mulf %67, %68 : vector<24x24xf32>
    %70 = vector.broadcast %11 : vector<1x24xf32> to vector<24x24xf32>
    %71 = arith.addf %69, %70 : vector<24x24xf32>
    %cst_30 = arith.constant dense<0xFF800000> : vector<24xf32>
    %72 = vector.multi_reduction <maximumf>, %71, %cst_30 [1] : vector<24x24xf32> to vector<24xf32>
    %73 = vector.shape_cast %72 : vector<24xf32> to vector<24x1xf32>
    %74 = vector.broadcast %73 : vector<24x1xf32> to vector<24x24xf32>
    %75 = arith.subf %71, %74 : vector<24x24xf32>
    %76 = math.exp %75 : vector<24x24xf32>
    %cst_31 = arith.constant dense<0.000000e+00> : vector<24xf32>
    %77 = vector.multi_reduction <add>, %76, %cst_31 [1] : vector<24x24xf32> to vector<24xf32>
    %78 = vector.shape_cast %77 : vector<24xf32> to vector<24x1xf32>
    %79 = tpu.reciprocal %78 {approx = true} : vector<24x1xf32> -> vector<24x1xf32>
    %80 = vector.broadcast %79 : vector<24x1xf32> to vector<24x24xf32>
    %81 = arith.mulf %76, %80 : vector<24x24xf32>
    %cst_32 = arith.constant dense<0.000000e+00> : vector<24x16xf32>
    %82 = tpu.matmul %81, %66, %cst_32 {dimension_numbers = #tpu.dot_dimension_numbers<[1], [0], [0], [1], [0, 0, 1, 1], [], []>} : vector<24x24xf32>, vector<24x16xf32>, vector<24x16xf32> -> vector<24x16xf32>
    %83 = tpu.concatenate %63, %82 in 1 : vector<24x16xf32>, vector<24x16xf32> -> vector<24x32xf32>
    %c0_33 = arith.constant 0 : index
    %c0_34 = arith.constant 0 : index
    %c0_35 = arith.constant 0 : index
    %84 = vector.load %arg7[%c0_33, %c0_34, %c0_35] : memref<2x32x32xf32, #tpu.memory_space<vmem>>, vector<1x32x32xf32>
    %85 = vector.shape_cast %84 : vector<1x32x32xf32> to vector<32x32xf32>
    %cst_36 = arith.constant dense<0.000000e+00> : vector<24x32xf32>
    %86 = tpu.matmul %83, %85, %cst_36 {dimension_numbers = #tpu.dot_dimension_numbers<[1], [0], [0], [1], [0, 0, 1, 1], [], []>} : vector<24x32xf32>, vector<32x32xf32>, vector<24x32xf32> -> vector<24x32xf32>
    %87 = arith.addf %5, %86 : vector<24x32xf32>
    %c0_37 = arith.constant 0 : index
    %c0_38 = arith.constant 0 : index
    %c0_39 = arith.constant 0 : index
    %88 = vector.load %arg8[%c0_37, %c0_38, %c0_39] : memref<2x1x32xf32, #tpu.memory_space<vmem>>, vector<1x1x32xf32>
    %89 = vector.shape_cast %88 : vector<1x1x32xf32> to vector<1x32xf32>
    %90 = vector.broadcast %89 : vector<1x32xf32> to vector<24x32xf32>
    %91 = arith.addf %87, %90 : vector<24x32xf32>
    %92 = vector.extract_strided_slice %13 {offsets = [2, 0], sizes = [1, 32], strides = [1, 1]} : vector<4x32xf32> to vector<1x32xf32>
    %93 = vector.extract_strided_slice %13 {offsets = [3, 0], sizes = [1, 32], strides = [1, 1]} : vector<4x32xf32> to vector<1x32xf32>
    %cst_40 = arith.constant dense<0.000000e+00> : vector<24xf32>
    %94 = vector.multi_reduction <add>, %91, %cst_40 [1] : vector<24x32xf32> to vector<24xf32>
    %95 = vector.shape_cast %94 : vector<24xf32> to vector<24x1xf32>
    %cst_41 = arith.constant 3.200000e+01 : f32
    %96 = vector.broadcast %cst_41 : f32 to vector<24x1xf32>
    %97 = arith.divf %95, %96 : vector<24x1xf32>
    %98 = vector.broadcast %97 : vector<24x1xf32> to vector<24x32xf32>
    %99 = arith.subf %91, %98 : vector<24x32xf32>
    %100 = arith.mulf %99, %99 : vector<24x32xf32>
    %cst_42 = arith.constant dense<0.000000e+00> : vector<24xf32>
    %101 = vector.multi_reduction <add>, %100, %cst_42 [1] : vector<24x32xf32> to vector<24xf32>
    %102 = vector.shape_cast %101 : vector<24xf32> to vector<24x1xf32>
    %cst_43 = arith.constant 3.200000e+01 : f32
    %103 = vector.broadcast %cst_43 : f32 to vector<24x1xf32>
    %104 = arith.divf %102, %103 : vector<24x1xf32>
    %105 = vector.broadcast %97 : vector<24x1xf32> to vector<24x32xf32>
    %106 = arith.subf %91, %105 : vector<24x32xf32>
    %cst_44 = arith.constant 9.99999996E-13 : f32
    %107 = vector.broadcast %cst_44 : f32 to vector<24x1xf32>
    %108 = arith.addf %104, %107 : vector<24x1xf32>
    %109 = math.rsqrt %108 : vector<24x1xf32>
    %110 = vector.broadcast %109 : vector<24x1xf32> to vector<24x32xf32>
    %111 = arith.mulf %106, %110 : vector<24x32xf32>
    %112 = vector.broadcast %92 : vector<1x32xf32> to vector<24x32xf32>
    %113 = arith.mulf %111, %112 : vector<24x32xf32>
    %114 = vector.broadcast %93 : vector<1x32xf32> to vector<24x32xf32>
    %115 = arith.addf %113, %114 : vector<24x32xf32>
    %c0_45 = arith.constant 0 : index
    %c0_46 = arith.constant 0 : index
    %c0_47 = arith.constant 0 : index
    %116 = vector.load %arg9[%c0_45, %c0_46, %c0_47] : memref<2x32x64xf32, #tpu.memory_space<vmem>>, vector<1x32x64xf32>
    %117 = vector.shape_cast %116 : vector<1x32x64xf32> to vector<32x64xf32>
    %cst_48 = arith.constant dense<0.000000e+00> : vector<24x64xf32>
    %118 = tpu.matmul %115, %117, %cst_48 {dimension_numbers = #tpu.dot_dimension_numbers<[1], [0], [0], [1], [0, 0, 1, 1], [], []>} : vector<24x32xf32>, vector<32x64xf32>, vector<24x64xf32> -> vector<24x64xf32>
    %c0_49 = arith.constant 0 : index
    %c0_50 = arith.constant 0 : index
    %c0_51 = arith.constant 0 : index
    %119 = vector.load %arg10[%c0_49, %c0_50, %c0_51] : memref<2x1x64xf32, #tpu.memory_space<vmem>>, vector<1x1x64xf32>
    %120 = vector.shape_cast %119 : vector<1x1x64xf32> to vector<1x64xf32>
    %121 = vector.broadcast %120 : vector<1x64xf32> to vector<24x64xf32>
    %122 = arith.addf %118, %121 : vector<24x64xf32>
    %cst_52 = arith.constant 5.000000e-01 : f32
    %123 = vector.broadcast %cst_52 : f32 to vector<24x64xf32>
    %124 = arith.mulf %123, %122 : vector<24x64xf32>
    %cst_53 = arith.constant 4.471500e-02 : f32
    %125 = vector.broadcast %cst_53 : f32 to vector<24x64xf32>
    %126 = arith.mulf %125, %122 : vector<24x64xf32>
    %127 = arith.mulf %126, %122 : vector<24x64xf32>
    %128 = arith.mulf %127, %122 : vector<24x64xf32>
    %129 = arith.addf %122, %128 : vector<24x64xf32>
    %cst_54 = arith.constant 0.797884583 : f32
    %130 = vector.broadcast %cst_54 : f32 to vector<24x64xf32>
    %131 = arith.mulf %130, %129 : vector<24x64xf32>
    %132 = math.tanh %131 : vector<24x64xf32>
    %cst_55 = arith.constant 1.000000e+00 : f32
    %133 = vector.broadcast %cst_55 : f32 to vector<24x64xf32>
    %134 = arith.addf %133, %132 : vector<24x64xf32>
    %135 = arith.mulf %124, %134 : vector<24x64xf32>
    %c0_56 = arith.constant 0 : index
    %c0_57 = arith.constant 0 : index
    %c0_58 = arith.constant 0 : index
    %136 = vector.load %arg11[%c0_56, %c0_57, %c0_58] : memref<2x64x32xf32, #tpu.memory_space<vmem>>, vector<1x64x32xf32>
    %137 = vector.shape_cast %136 : vector<1x64x32xf32> to vector<64x32xf32>
    %cst_59 = arith.constant dense<0.000000e+00> : vector<24x32xf32>
    %138 = tpu.matmul %135, %137, %cst_59 {dimension_numbers = #tpu.dot_dimension_numbers<[1], [0], [0], [1], [0, 0, 1, 1], [], []>} : vector<24x64xf32>, vector<64x32xf32>, vector<24x32xf32> -> vector<24x32xf32>
    %139 = arith.addf %91, %138 : vector<24x32xf32>
    %c0_60 = arith.constant 0 : index
    %c0_61 = arith.constant 0 : index
    %c0_62 = arith.constant 0 : index
    %140 = vector.load %arg12[%c0_60, %c0_61, %c0_62] : memref<2x1x32xf32, #tpu.memory_space<vmem>>, vector<1x1x32xf32>
    %141 = vector.shape_cast %140 : vector<1x1x32xf32> to vector<1x32xf32>
    %142 = vector.broadcast %141 : vector<1x32xf32> to vector<24x32xf32>
    %143 = arith.addf %139, %142 : vector<24x32xf32>
    %c1 = arith.constant 1 : index
    %c0_63 = arith.constant 0 : index
    %c0_64 = arith.constant 0 : index
    %144 = vector.load %arg4[%c1, %c0_63, %c0_64] : memref<2x4x32xf32, #tpu.memory_space<vmem>>, vector<1x4x32xf32>
    %145 = vector.shape_cast %144 : vector<1x4x32xf32> to vector<4x32xf32>
    %146 = vector.extract_strided_slice %145 {offsets = [0, 0], sizes = [1, 32], strides = [1, 1]} : vector<4x32xf32> to vector<1x32xf32>
    %147 = vector.extract_strided_slice %145 {offsets = [1, 0], sizes = [1, 32], strides = [1, 1]} : vector<4x32xf32> to vector<1x32xf32>
    %cst_65 = arith.constant dense<0.000000e+00> : vector<24xf32>
    %148 = vector.multi_reduction <add>, %143, %cst_65 [1] : vector<24x32xf32> to vector<24xf32>
    %149 = vector.shape_cast %148 : vector<24xf32> to vector<24x1xf32>
    %cst_66 = arith.constant 3.200000e+01 : f32
    %150 = vector.broadcast %cst_66 : f32 to vector<24x1xf32>
    %151 = arith.divf %149, %150 : vector<24x1xf32>
    %152 = vector.broadcast %151 : vector<24x1xf32> to vector<24x32xf32>
    %153 = arith.subf %143, %152 : vector<24x32xf32>
    %154 = arith.mulf %153, %153 : vector<24x32xf32>
    %cst_67 = arith.constant dense<0.000000e+00> : vector<24xf32>
    %155 = vector.multi_reduction <add>, %154, %cst_67 [1] : vector<24x32xf32> to vector<24xf32>
    %156 = vector.shape_cast %155 : vector<24xf32> to vector<24x1xf32>
    %cst_68 = arith.constant 3.200000e+01 : f32
    %157 = vector.broadcast %cst_68 : f32 to vector<24x1xf32>
    %158 = arith.divf %156, %157 : vector<24x1xf32>
    %159 = vector.broadcast %151 : vector<24x1xf32> to vector<24x32xf32>
    %160 = arith.subf %143, %159 : vector<24x32xf32>
    %cst_69 = arith.constant 9.99999996E-13 : f32
    %161 = vector.broadcast %cst_69 : f32 to vector<24x1xf32>
    %162 = arith.addf %158, %161 : vector<24x1xf32>
    %163 = math.rsqrt %162 : vector<24x1xf32>
    %164 = vector.broadcast %163 : vector<24x1xf32> to vector<24x32xf32>
    %165 = arith.mulf %160, %164 : vector<24x32xf32>
    %166 = vector.broadcast %146 : vector<1x32xf32> to vector<24x32xf32>
    %167 = arith.mulf %165, %166 : vector<24x32xf32>
    %168 = vector.broadcast %147 : vector<1x32xf32> to vector<24x32xf32>
    %169 = arith.addf %167, %168 : vector<24x32xf32>
    %c1_70 = arith.constant 1 : index
    %c0_71 = arith.constant 0 : index
    %c0_72 = arith.constant 0 : index
    %170 = vector.load %arg5[%c1_70, %c0_71, %c0_72] : memref<2x32x96xf32, #tpu.memory_space<vmem>>, vector<1x32x96xf32>
    %171 = vector.shape_cast %170 : vector<1x32x96xf32> to vector<32x96xf32>
    %cst_73 = arith.constant dense<0.000000e+00> : vector<24x96xf32>
    %172 = tpu.matmul %169, %171, %cst_73 {dimension_numbers = #tpu.dot_dimension_numbers<[1], [0], [0], [1], [0, 0, 1, 1], [], []>} : vector<24x32xf32>, vector<32x96xf32>, vector<24x96xf32> -> vector<24x96xf32>
    %c1_74 = arith.constant 1 : index
    %c0_75 = arith.constant 0 : index
    %c0_76 = arith.constant 0 : index
    %173 = vector.load %arg6[%c1_74, %c0_75, %c0_76] : memref<2x1x96xf32, #tpu.memory_space<vmem>>, vector<1x1x96xf32>
    %174 = vector.shape_cast %173 : vector<1x1x96xf32> to vector<1x96xf32>
    %175 = vector.broadcast %174 : vector<1x96xf32> to vector<24x96xf32>
    %176 = arith.addf %172, %175 : vector<24x96xf32>
    %177 = vector.extract_strided_slice %176 {offsets = [0, 0], sizes = [24, 16], strides = [1, 1]} : vector<24x96xf32> to vector<24x16xf32>
    %178 = vector.extract_strided_slice %176 {offsets = [0, 32], sizes = [24, 16], strides = [1, 1]} : vector<24x96xf32> to vector<24x16xf32>
    %179 = vector.extract_strided_slice %176 {offsets = [0, 64], sizes = [24, 16], strides = [1, 1]} : vector<24x96xf32> to vector<24x16xf32>
    %cst_77 = arith.constant dense<0.000000e+00> : vector<24x24xf32>
    %180 = tpu.matmul %177, %178, %cst_77 {dimension_numbers = #tpu.dot_dimension_numbers<[1], [1], [0], [0], [0, 0, 1, 0], [], []>} : vector<24x16xf32>, vector<24x16xf32>, vector<24x24xf32> -> vector<24x24xf32>
    %cst_78 = arith.constant 2.500000e-01 : f32
    %181 = vector.broadcast %cst_78 : f32 to vector<24x24xf32>
    %182 = arith.mulf %180, %181 : vector<24x24xf32>
    %183 = vector.broadcast %11 : vector<1x24xf32> to vector<24x24xf32>
    %184 = arith.addf %182, %183 : vector<24x24xf32>
    %cst_79 = arith.constant dense<0xFF800000> : vector<24xf32>
    %185 = vector.multi_reduction <maximumf>, %184, %cst_79 [1] : vector<24x24xf32> to vector<24xf32>
    %186 = vector.shape_cast %185 : vector<24xf32> to vector<24x1xf32>
    %187 = vector.broadcast %186 : vector<24x1xf32> to vector<24x24xf32>
    %188 = arith.subf %184, %187 : vector<24x24xf32>
    %189 = math.exp %188 : vector<24x24xf32>
    %cst_80 = arith.constant dense<0.000000e+00> : vector<24xf32>
    %190 = vector.multi_reduction <add>, %189, %cst_80 [1] : vector<24x24xf32> to vector<24xf32>
    %191 = vector.shape_cast %190 : vector<24xf32> to vector<24x1xf32>
    %192 = tpu.reciprocal %191 {approx = true} : vector<24x1xf32> -> vector<24x1xf32>
    %193 = vector.broadcast %192 : vector<24x1xf32> to vector<24x24xf32>
    %194 = arith.mulf %189, %193 : vector<24x24xf32>
    %cst_81 = arith.constant dense<0.000000e+00> : vector<24x16xf32>
    %195 = tpu.matmul %194, %179, %cst_81 {dimension_numbers = #tpu.dot_dimension_numbers<[1], [0], [0], [1], [0, 0, 1, 1], [], []>} : vector<24x24xf32>, vector<24x16xf32>, vector<24x16xf32> -> vector<24x16xf32>
    %196 = vector.extract_strided_slice %176 {offsets = [0, 16], sizes = [24, 16], strides = [1, 1]} : vector<24x96xf32> to vector<24x16xf32>
    %197 = vector.extract_strided_slice %176 {offsets = [0, 48], sizes = [24, 16], strides = [1, 1]} : vector<24x96xf32> to vector<24x16xf32>
    %198 = vector.extract_strided_slice %176 {offsets = [0, 80], sizes = [24, 16], strides = [1, 1]} : vector<24x96xf32> to vector<24x16xf32>
    %cst_82 = arith.constant dense<0.000000e+00> : vector<24x24xf32>
    %199 = tpu.matmul %196, %197, %cst_82 {dimension_numbers = #tpu.dot_dimension_numbers<[1], [1], [0], [0], [0, 0, 1, 0], [], []>} : vector<24x16xf32>, vector<24x16xf32>, vector<24x24xf32> -> vector<24x24xf32>
    %cst_83 = arith.constant 2.500000e-01 : f32
    %200 = vector.broadcast %cst_83 : f32 to vector<24x24xf32>
    %201 = arith.mulf %199, %200 : vector<24x24xf32>
    %202 = vector.broadcast %11 : vector<1x24xf32> to vector<24x24xf32>
    %203 = arith.addf %201, %202 : vector<24x24xf32>
    %cst_84 = arith.constant dense<0xFF800000> : vector<24xf32>
    %204 = vector.multi_reduction <maximumf>, %203, %cst_84 [1] : vector<24x24xf32> to vector<24xf32>
    %205 = vector.shape_cast %204 : vector<24xf32> to vector<24x1xf32>
    %206 = vector.broadcast %205 : vector<24x1xf32> to vector<24x24xf32>
    %207 = arith.subf %203, %206 : vector<24x24xf32>
    %208 = math.exp %207 : vector<24x24xf32>
    %cst_85 = arith.constant dense<0.000000e+00> : vector<24xf32>
    %209 = vector.multi_reduction <add>, %208, %cst_85 [1] : vector<24x24xf32> to vector<24xf32>
    %210 = vector.shape_cast %209 : vector<24xf32> to vector<24x1xf32>
    %211 = tpu.reciprocal %210 {approx = true} : vector<24x1xf32> -> vector<24x1xf32>
    %212 = vector.broadcast %211 : vector<24x1xf32> to vector<24x24xf32>
    %213 = arith.mulf %208, %212 : vector<24x24xf32>
    %cst_86 = arith.constant dense<0.000000e+00> : vector<24x16xf32>
    %214 = tpu.matmul %213, %198, %cst_86 {dimension_numbers = #tpu.dot_dimension_numbers<[1], [0], [0], [1], [0, 0, 1, 1], [], []>} : vector<24x24xf32>, vector<24x16xf32>, vector<24x16xf32> -> vector<24x16xf32>
    %215 = tpu.concatenate %195, %214 in 1 : vector<24x16xf32>, vector<24x16xf32> -> vector<24x32xf32>
    %c1_87 = arith.constant 1 : index
    %c0_88 = arith.constant 0 : index
    %c0_89 = arith.constant 0 : index
    %216 = vector.load %arg7[%c1_87, %c0_88, %c0_89] : memref<2x32x32xf32, #tpu.memory_space<vmem>>, vector<1x32x32xf32>
    %217 = vector.shape_cast %216 : vector<1x32x32xf32> to vector<32x32xf32>
    %cst_90 = arith.constant dense<0.000000e+00> : vector<24x32xf32>
    %218 = tpu.matmul %215, %217, %cst_90 {dimension_numbers = #tpu.dot_dimension_numbers<[1], [0], [0], [1], [0, 0, 1, 1], [], []>} : vector<24x32xf32>, vector<32x32xf32>, vector<24x32xf32> -> vector<24x32xf32>
    %219 = arith.addf %143, %218 : vector<24x32xf32>
    %c1_91 = arith.constant 1 : index
    %c0_92 = arith.constant 0 : index
    %c0_93 = arith.constant 0 : index
    %220 = vector.load %arg8[%c1_91, %c0_92, %c0_93] : memref<2x1x32xf32, #tpu.memory_space<vmem>>, vector<1x1x32xf32>
    %221 = vector.shape_cast %220 : vector<1x1x32xf32> to vector<1x32xf32>
    %222 = vector.broadcast %221 : vector<1x32xf32> to vector<24x32xf32>
    %223 = arith.addf %219, %222 : vector<24x32xf32>
    %224 = vector.extract_strided_slice %145 {offsets = [2, 0], sizes = [1, 32], strides = [1, 1]} : vector<4x32xf32> to vector<1x32xf32>
    %225 = vector.extract_strided_slice %145 {offsets = [3, 0], sizes = [1, 32], strides = [1, 1]} : vector<4x32xf32> to vector<1x32xf32>
    %cst_94 = arith.constant dense<0.000000e+00> : vector<24xf32>
    %226 = vector.multi_reduction <add>, %223, %cst_94 [1] : vector<24x32xf32> to vector<24xf32>
    %227 = vector.shape_cast %226 : vector<24xf32> to vector<24x1xf32>
    %cst_95 = arith.constant 3.200000e+01 : f32
    %228 = vector.broadcast %cst_95 : f32 to vector<24x1xf32>
    %229 = arith.divf %227, %228 : vector<24x1xf32>
    %230 = vector.broadcast %229 : vector<24x1xf32> to vector<24x32xf32>
    %231 = arith.subf %223, %230 : vector<24x32xf32>
    %232 = arith.mulf %231, %231 : vector<24x32xf32>
    %cst_96 = arith.constant dense<0.000000e+00> : vector<24xf32>
    %233 = vector.multi_reduction <add>, %232, %cst_96 [1] : vector<24x32xf32> to vector<24xf32>
    %234 = vector.shape_cast %233 : vector<24xf32> to vector<24x1xf32>
    %cst_97 = arith.constant 3.200000e+01 : f32
    %235 = vector.broadcast %cst_97 : f32 to vector<24x1xf32>
    %236 = arith.divf %234, %235 : vector<24x1xf32>
    %237 = vector.broadcast %229 : vector<24x1xf32> to vector<24x32xf32>
    %238 = arith.subf %223, %237 : vector<24x32xf32>
    %cst_98 = arith.constant 9.99999996E-13 : f32
    %239 = vector.broadcast %cst_98 : f32 to vector<24x1xf32>
    %240 = arith.addf %236, %239 : vector<24x1xf32>
    %241 = math.rsqrt %240 : vector<24x1xf32>
    %242 = vector.broadcast %241 : vector<24x1xf32> to vector<24x32xf32>
    %243 = arith.mulf %238, %242 : vector<24x32xf32>
    %244 = vector.broadcast %224 : vector<1x32xf32> to vector<24x32xf32>
    %245 = arith.mulf %243, %244 : vector<24x32xf32>
    %246 = vector.broadcast %225 : vector<1x32xf32> to vector<24x32xf32>
    %247 = arith.addf %245, %246 : vector<24x32xf32>
    %c1_99 = arith.constant 1 : index
    %c0_100 = arith.constant 0 : index
    %c0_101 = arith.constant 0 : index
    %248 = vector.load %arg9[%c1_99, %c0_100, %c0_101] : memref<2x32x64xf32, #tpu.memory_space<vmem>>, vector<1x32x64xf32>
    %249 = vector.shape_cast %248 : vector<1x32x64xf32> to vector<32x64xf32>
    %cst_102 = arith.constant dense<0.000000e+00> : vector<24x64xf32>
    %250 = tpu.matmul %247, %249, %cst_102 {dimension_numbers = #tpu.dot_dimension_numbers<[1], [0], [0], [1], [0, 0, 1, 1], [], []>} : vector<24x32xf32>, vector<32x64xf32>, vector<24x64xf32> -> vector<24x64xf32>
    %c1_103 = arith.constant 1 : index
    %c0_104 = arith.constant 0 : index
    %c0_105 = arith.constant 0 : index
    %251 = vector.load %arg10[%c1_103, %c0_104, %c0_105] : memref<2x1x64xf32, #tpu.memory_space<vmem>>, vector<1x1x64xf32>
    %252 = vector.shape_cast %251 : vector<1x1x64xf32> to vector<1x64xf32>
    %253 = vector.broadcast %252 : vector<1x64xf32> to vector<24x64xf32>
    %254 = arith.addf %250, %253 : vector<24x64xf32>
    %cst_106 = arith.constant 5.000000e-01 : f32
    %255 = vector.broadcast %cst_106 : f32 to vector<24x64xf32>
    %256 = arith.mulf %255, %254 : vector<24x64xf32>
    %cst_107 = arith.constant 4.471500e-02 : f32
    %257 = vector.broadcast %cst_107 : f32 to vector<24x64xf32>
    %258 = arith.mulf %257, %254 : vector<24x64xf32>
    %259 = arith.mulf %258, %254 : vector<24x64xf32>
    %260 = arith.mulf %259, %254 : vector<24x64xf32>
    %261 = arith.addf %254, %260 : vector<24x64xf32>
    %cst_108 = arith.constant 0.797884583 : f32
    %262 = vector.broadcast %cst_108 : f32 to vector<24x64xf32>
    %263 = arith.mulf %262, %261 : vector<24x64xf32>
    %264 = math.tanh %263 : vector<24x64xf32>
    %cst_109 = arith.constant 1.000000e+00 : f32
    %265 = vector.broadcast %cst_109 : f32 to vector<24x64xf32>
    %266 = arith.addf %265, %264 : vector<24x64xf32>
    %267 = arith.mulf %256, %266 : vector<24x64xf32>
    %c1_110 = arith.constant 1 : index
    %c0_111 = arith.constant 0 : index
    %c0_112 = arith.constant 0 : index
    %268 = vector.load %arg11[%c1_110, %c0_111, %c0_112] : memref<2x64x32xf32, #tpu.memory_space<vmem>>, vector<1x64x32xf32>
    %269 = vector.shape_cast %268 : vector<1x64x32xf32> to vector<64x32xf32>
    %cst_113 = arith.constant dense<0.000000e+00> : vector<24x32xf32>
    %270 = tpu.matmul %267, %269, %cst_113 {dimension_numbers = #tpu.dot_dimension_numbers<[1], [0], [0], [1], [0, 0, 1, 1], [], []>} : vector<24x64xf32>, vector<64x32xf32>, vector<24x32xf32> -> vector<24x32xf32>
    %271 = arith.addf %223, %270 : vector<24x32xf32>
    %c1_114 = arith.constant 1 : index
    %c0_115 = arith.constant 0 : index
    %c0_116 = arith.constant 0 : index
    %272 = vector.load %arg12[%c1_114, %c0_115, %c0_116] : memref<2x1x32xf32, #tpu.memory_space<vmem>>, vector<1x1x32xf32>
    %273 = vector.shape_cast %272 : vector<1x1x32xf32> to vector<1x32xf32>
    %274 = vector.broadcast %273 : vector<1x32xf32> to vector<24x32xf32>
    %275 = arith.addf %271, %274 : vector<24x32xf32>
    %c0_117 = arith.constant 0 : index
    %c0_118 = arith.constant 0 : index
    %276 = vector.load %arg13[%c0_117, %c0_118] : memref<2x32xf32, #tpu.memory_space<vmem>>, vector<2x32xf32>
    %277 = vector.extract_strided_slice %275 {offsets = [0, 0], sizes = [1, 32], strides = [1, 1]} : vector<24x32xf32> to vector<1x32xf32>
    %278 = vector.extract_strided_slice %276 {offsets = [0, 0], sizes = [1, 32], strides = [1, 1]} : vector<2x32xf32> to vector<1x32xf32>
    %279 = vector.extract_strided_slice %276 {offsets = [1, 0], sizes = [1, 32], strides = [1, 1]} : vector<2x32xf32> to vector<1x32xf32>
    %cst_119 = arith.constant dense<0.000000e+00> : vector<1xf32>
    %280 = vector.multi_reduction <add>, %277, %cst_119 [1] : vector<1x32xf32> to vector<1xf32>
    %281 = vector.shape_cast %280 : vector<1xf32> to vector<1x1xf32>
    %cst_120 = arith.constant 3.200000e+01 : f32
    %282 = vector.broadcast %cst_120 : f32 to vector<1x1xf32>
    %283 = arith.divf %281, %282 : vector<1x1xf32>
    %284 = vector.broadcast %283 : vector<1x1xf32> to vector<1x32xf32>
    %285 = arith.subf %277, %284 : vector<1x32xf32>
    %286 = arith.mulf %285, %285 : vector<1x32xf32>
    %cst_121 = arith.constant dense<0.000000e+00> : vector<1xf32>
    %287 = vector.multi_reduction <add>, %286, %cst_121 [1] : vector<1x32xf32> to vector<1xf32>
    %288 = vector.shape_cast %287 : vector<1xf32> to vector<1x1xf32>
    %cst_122 = arith.constant 3.200000e+01 : f32
    %289 = vector.broadcast %cst_122 : f32 to vector<1x1xf32>
    %290 = arith.divf %288, %289 : vector<1x1xf32>
    %291 = vector.broadcast %283 : vector<1x1xf32> to vector<1x32xf32>
    %292 = arith.subf %277, %291 : vector<1x32xf32>
    %cst_123 = arith.constant 9.99999996E-13 : f32
    %293 = vector.broadcast %cst_123 : f32 to vector<1x1xf32>
    %294 = arith.addf %290, %293 : vector<1x1xf32>
    %295 = math.rsqrt %294 : vector<1x1xf32>
    %296 = vector.broadcast %295 : vector<1x1xf32> to vector<1x32xf32>
    %297 = arith.mulf %292, %296 : vector<1x32xf32>
    %298 = arith.mulf %297, %278 : vector<1x32xf32>
    %299 = arith.addf %298, %279 : vector<1x32xf32>
    %c0_124 = arith.constant 0 : index
    %c0_125 = arith.constant 0 : index
    %300 = vector.load %arg14[%c0_124, %c0_125] : memref<32x128xf32, #tpu.memory_space<vmem>>, vector<32x128xf32>
    %cst_126 = arith.constant dense<0.000000e+00> : vector<1x128xf32>
    %301 = tpu.matmul %299, %300, %cst_126 {dimension_numbers = #tpu.dot_dimension_numbers<[1], [0], [0], [1], [0, 0, 1, 1], [], []>} : vector<1x32xf32>, vector<32x128xf32>, vector<1x128xf32> -> vector<1x128xf32>
    %c0_127 = arith.constant 0 : index
    %c0_128 = arith.constant 0 : index
    %302 = vector.load %arg15[%c0_127, %c0_128] : memref<1x128xf32, #tpu.memory_space<vmem>>, vector<1x128xf32>
    %303 = arith.addf %301, %302 : vector<1x128xf32>
    %304 = vector.shape_cast %303 : vector<1x128xf32> to vector<1x1x128xf32>
    %c0_129 = arith.constant 0 : index
    %c0_130 = arith.constant 0 : index
    %c0_131 = arith.constant 0 : index
    %305 = vector.load %arg16[%c0_129, %c0_130, %c0_131] : memref<1x1x128xf32, #tpu.memory_space<vmem>>, vector<1x1x128xf32>
    tpu.vector_store %arg16[%c0_129, %c0_130, %c0_131], %304 {strides = array<i32>} : memref<1x1x128xf32, #tpu.memory_space<vmem>>, vector<1x1x128xf32>,
    return
  }
  func.func @transform_0(%arg0: i32) -> (i32, i32, i32) {
    %c0_i32 = arith.constant 0 : i32
    %c0_i32_0 = arith.constant 0 : i32
    %c0_i32_1 = arith.constant 0 : i32
    return %arg0, %c0_i32, %c0_i32_0 : i32, i32, i32
  }
  func.func @transform_1(%arg0: i32) -> (i32, i32) {
    %c0_i32 = arith.constant 0 : i32
    %c0_i32_0 = arith.constant 0 : i32
    %c0_i32_1 = arith.constant 0 : i32
    return %c0_i32, %c0_i32_0 : i32, i32
  }
  func.func @transform_2(%arg0: i32) -> (i32, i32) {
    %c0_i32 = arith.constant 0 : i32
    %c0_i32_0 = arith.constant 0 : i32
    %c0_i32_1 = arith.constant 0 : i32
    return %c0_i32, %c0_i32_0 : i32, i32
  }
  func.func @transform_3(%arg0: i32) -> (i32, i32, i32) {
    %c0_i32 = arith.constant 0 : i32
    %c0_i32_0 = arith.constant 0 : i32
    %c0_i32_1 = arith.constant 0 : i32
    %c0_i32_2 = arith.constant 0 : i32
    return %c0_i32, %c0_i32_0, %c0_i32_1 : i32, i32, i32
  }
  func.func @transform_4(%arg0: i32) -> (i32, i32, i32) {
    %c0_i32 = arith.constant 0 : i32
    %c0_i32_0 = arith.constant 0 : i32
    %c0_i32_1 = arith.constant 0 : i32
    %c0_i32_2 = arith.constant 0 : i32
    return %c0_i32, %c0_i32_0, %c0_i32_1 : i32, i32, i32
  }
  func.func @transform_5(%arg0: i32) -> (i32, i32, i32) {
    %c0_i32 = arith.constant 0 : i32
    %c0_i32_0 = arith.constant 0 : i32
    %c0_i32_1 = arith.constant 0 : i32
    %c0_i32_2 = arith.constant 0 : i32
    return %c0_i32, %c0_i32_0, %c0_i32_1 : i32, i32, i32
  }
  func.func @transform_6(%arg0: i32) -> (i32, i32, i32) {
    %c0_i32 = arith.constant 0 : i32
    %c0_i32_0 = arith.constant 0 : i32
    %c0_i32_1 = arith.constant 0 : i32
    %c0_i32_2 = arith.constant 0 : i32
    return %c0_i32, %c0_i32_0, %c0_i32_1 : i32, i32, i32
  }
  func.func @transform_7(%arg0: i32) -> (i32, i32, i32) {
    %c0_i32 = arith.constant 0 : i32
    %c0_i32_0 = arith.constant 0 : i32
    %c0_i32_1 = arith.constant 0 : i32
    %c0_i32_2 = arith.constant 0 : i32
    return %c0_i32, %c0_i32_0, %c0_i32_1 : i32, i32, i32
  }
  func.func @transform_8(%arg0: i32) -> (i32, i32, i32) {
    %c0_i32 = arith.constant 0 : i32
    %c0_i32_0 = arith.constant 0 : i32
    %c0_i32_1 = arith.constant 0 : i32
    %c0_i32_2 = arith.constant 0 : i32
    return %c0_i32, %c0_i32_0, %c0_i32_1 : i32, i32, i32
  }
  func.func @transform_9(%arg0: i32) -> (i32, i32, i32) {
    %c0_i32 = arith.constant 0 : i32
    %c0_i32_0 = arith.constant 0 : i32
    %c0_i32_1 = arith.constant 0 : i32
    %c0_i32_2 = arith.constant 0 : i32
    return %c0_i32, %c0_i32_0, %c0_i32_1 : i32, i32, i32
  }
  func.func @transform_10(%arg0: i32) -> (i32, i32, i32) {
    %c0_i32 = arith.constant 0 : i32
    %c0_i32_0 = arith.constant 0 : i32
    %c0_i32_1 = arith.constant 0 : i32
    %c0_i32_2 = arith.constant 0 : i32
    return %c0_i32, %c0_i32_0, %c0_i32_1 : i32, i32, i32
  }
  func.func @transform_11(%arg0: i32) -> (i32, i32, i32) {
    %c0_i32 = arith.constant 0 : i32
    %c0_i32_0 = arith.constant 0 : i32
    %c0_i32_1 = arith.constant 0 : i32
    %c0_i32_2 = arith.constant 0 : i32
    return %c0_i32, %c0_i32_0, %c0_i32_1 : i32, i32, i32
  }
  func.func @transform_12(%arg0: i32) -> (i32, i32) {
    %c0_i32 = arith.constant 0 : i32
    %c0_i32_0 = arith.constant 0 : i32
    %c0_i32_1 = arith.constant 0 : i32
    return %c0_i32, %c0_i32_0 : i32, i32
  }
  func.func @transform_13(%arg0: i32) -> (i32, i32) {
    %c0_i32 = arith.constant 0 : i32
    %c0_i32_0 = arith.constant 0 : i32
    %c0_i32_1 = arith.constant 0 : i32
    return %c0_i32, %c0_i32_0 : i32, i32
  }
  func.func @transform_14(%arg0: i32) -> (i32, i32) {
    %c0_i32 = arith.constant 0 : i32
    %c0_i32_0 = arith.constant 0 : i32
    %c0_i32_1 = arith.constant 0 : i32
    return %c0_i32, %c0_i32_0 : i32, i32
  }
  func.func @transform_15(%arg0: i32) -> (i32, i32, i32) {
    %c0_i32 = arith.constant 0 : i32
    %c0_i32_0 = arith.constant 0 : i32
    %c0_i32_1 = arith.constant 0 : i32
    return %arg0, %c0_i32, %c0_i32_0 : i32, i32, i32
  }
}

</mosaic_0001>

<bundles_post_ra>
// kernel: tpu_custom_call.1
= control target key start
LH: loop header
LB: loop body
LE: loop exit
PB: predicated region body
PF: predicated region fallthrough
CT: control target
= control target key end

     0   :  { %s5009_s0 = inlined_call_operand.hbm [shape: f32[2,24,48], index: 0, kind: input, shape index: {}]   ;;  %s5010_s1 = inlined_call_operand.vmem [shape: f32[48,32], index: 1, kind: input, shape index: {}]   ;;  %s5011_s2 = inlined_call_operand.hbm [shape: f32[24,32], index: 2, kind: input, shape index: {}]   ;;  %s5012_s3 = inlined_call_operand.hbm [shape: f32[2,4,32], index: 3, kind: input, shape index: {}]   ;;  %s5013_s4 = inlined_call_operand.vmem [shape: f32[2,32,96], index: 4, kind: input, shape index: {}]   ;;  %s5014_s5 = inlined_call_operand.vmem [shape: f32[2,1,96], index: 5, kind: input, shape index: {}]   ;;  %s5015_s6 = inlined_call_operand.vmem [shape: f32[2,32,32], index: 6, kind: input, shape index: {}]   ;;  %s5016_s7 = inlined_call_operand.hbm [shape: f32[2,1,32], index: 7, kind: input, shape index: {}]   ;;  %s5017_s8 = inlined_call_operand.vmem [shape: f32[2,32,64], index: 8, kind: input, shape index: {}]   ;;  %s5018_s9 = inlined_call_operand.hbm [shape: f32[2,1,64], index: 9, kind: input, shape index: {}]   ;;  %s5019_s10 = inlined_call_operand.vmem [shape: f32[2,64,32], index: 10, kind: input, shape index: {}]   ;;  %s5020_s11 = inlined_call_operand.hbm [shape: f32[2,1,32], index: 11, kind: input, shape index: {}]   ;;  %s5021_s12 = inlined_call_operand.vmem [shape: f32[2,32], index: 12, kind: input, shape index: {}]   ;;  %s5022_s13 = inlined_call_operand.vmem [shape: f32[32,128], index: 13, kind: input, shape index: {}]   ;;  %s5023_s14 = inlined_call_operand.vmem [shape: f32[1,128], index: 14, kind: input, shape index: {}]   ;;  %s5024_s15 = inlined_call_operand.hbm [shape: f32[2,1,128], index: 15, kind: output, shape index: {}]  }
   0x1   :  { %5036 = sst [smem:[#allocation20_spill]] %s5011_s2 }
   0x2   :  { %5037 = sst [smem:[#allocation21_spill]] %s5012_s3 }
   0x3   :  { %5038 = sst [smem:[#allocation22_spill]] %s5016_s7 }
   0x4   :  { %5039 = sst [smem:[#allocation23_spill]] %s5018_s9 }
   0x5   :  { %5040 = sst [smem:[#allocation24_spill]] %s5020_s11 }
   0x6   :  { %5041 = sst [smem:[#allocation25_spill]] %s5021_s12 }
   0x7   :  { %5042 = sst [smem:[#allocation26_spill]] %s5023_s14 }
   0x8   :  { %5043 = sst [smem:[#allocation27_spill]] %s5024_s15 }
   0x9   :  { %20 = vsyncpa [#allocation3], 0 }
   0xa   :  { %22 = vsyncpa [#allocation3 + $0x1], 0 }
   0xb   :  { %23 = vsyncpa [#allocation6], 0 }
   0xc   :  { %24 = vsyncpa [#allocation9], 0 }
   0xd   :  { %25 = vsyncpa [#allocation12], 0 }
   0xe   :  { %26 = vsyncpa [#allocation4], 0 }
   0xf   :  { %28 = vsyncpa [#allocation4 + $0x1], 0  ;;  %s4099_s18 = smov 0   ;;  %s4101_s19 = smov 0  }
  0x10   :  { %s4103_s20 = smov 0   ;;  %s4105_s21 = smov 0  }
  0x11 LB: > { %s3997_s22 = smov [#allocation5]   ;;  %s4120_s24 = sadd.s32 4294967295, %s3995_s21   ;;  %s3995_s21 = sphi %s4105_s21, %s5079_s21   ;;  %s3991_s20 = sphi %s4103_s20, %s5078_s20   ;;  %s3987_s19 = sphi %s4101_s19, %s5077_s19   ;;  %s3983_s18 = sphi %s4099_s18, %s5076_s18  }
  0x12   : > { %s400_s23 = sshll.u32 %s3997_s22, 4  ;;  %p3014_p0 = scmp.ge.s32.totalorder %s3995_s21, 1  ;;  %s401_s23 = int_to_ptr.vmem [resolvable:$true] %s400_s23 }
  0x13   : > { %p5032_p1 = scmp.eq.s32.totalorder %s4120_s24, 0  ;;  %p385_p2 = scmp.lt.s32.totalorder %s3995_s21, 3 }
  0x14   : > { %s3998_s26 = smov [#allocation8]   ;;  %s3999_s29 = smov [#allocation7]  }
  0x15   : > { %p4125_p3 = pnand %p3014_p0, %p385_p2  ;;  %s435_s27 = sshll.u32 %s3998_s26, 4  ;;  %s4138_s27 = int_to_ptr.vmem [resolvable:$true] %s435_s27 }
  0x16   : > { %s4140_s30 = sshll.u32 %s3999_s29, 4  ;;  %s3772_s17 = scalar_lea.vmem %s401_s23, 384  ;;  %s414_s30 = int_to_ptr.vmem [resolvable:$true] %s4140_s30 }
  0x17   : > { %s5044_s25 = scalar_select %p4125_p3, 1, 0 }
  0x18   : > { %p3587_p5 = pneg %p4125_p3  ;;  %p3773_p8 = scmp.ne.s32.totalorder %s401_s23, %s3772_s17 }
  0x19   : > { %p3780_p11 = scmp.lt.s32.totalorder %s401_s23, %s401_s23  ;;  %p3781_p12 = scmp.lt.s32.totalorder %s3772_s17, %s3772_s17 }
  0x1a   : > { %p4134_p6 = pnand %p3587_p5, %p5032_p1 }
  0x1b   : > { %p3782_p13 = por %p3781_p12, %p3780_p11 }
  0x1c   : > { %p4144_p7 = pneg %p4134_p6 }
  0x1e   : > { %p3775_p9 = pnand %p3773_p8, %p4144_p7 }
  0x20   : > { %p3776_p10 = pneg %p3775_p9 }
  0x22   : > { %p3783_p0 = pnand %p3782_p13, %p3776_p10 }
  0x24   : > { %3786 = shalt.err (!%p3783_p0)
}
  0x25   : > { %s5026_s22 = smov 128   ;;  %s5027_s26 = smov 8  }
  0x26   : > { %s5047_s2 = sld [smem:[#allocation20_spill]]  ;;  %s3798_s14 = scalar_lea.vmem %s4138_s27, 32 }
  0x27   : > { %p3799_p2 = scmp.ne.s32.totalorder %s4138_s27, %s3798_s14  ;;  %p3806_p9 = scmp.lt.s32.totalorder %s4138_s27, %s4138_s27 }
  0x28   : > { %p3807_p10 = scmp.lt.s32.totalorder %s3798_s14, %s3798_s14 }
  0x29   : > { %p3801_p5 = pnand %p3799_p2, %p4144_p7 }
  0x2a   : > { %p3808_p11 = por %p3807_p10, %p3806_p9 }
  0x2b   : > { %p3802_p8 = pneg %p3801_p5 }
  0x2c   : > { %3590 = dma.hbm_to_vmem [thread:$0]  (!%p4134_p6), %s5047_s2, 384, %s401_s23, [#allocation6], %s5026_s22, %s5026_s22, %s5027_s26  }
  0x2d   : > { %p3809_p12 = pnand %p3808_p11, %p3802_p8 }
  0x2f   : > { %3812 = shalt.err (!%p3809_p12)
}
  0x30   : > { %s5028_s17 = smov 16   ;;  %s5030_s12 = smov 1  }
  0x31   : > { %s5048_s7 = sld [smem:[#allocation22_spill]]  ;;  %s3824_s29 = scalar_lea.vmem %s414_s30, 128 }
  0x32   : > { %p3825_p13 = scmp.ne.s32.totalorder %s414_s30, %s3824_s29  ;;  %p3832_p5 = scmp.lt.s32.totalorder %s414_s30, %s414_s30 }
  0x33   : > { %p3833_p8 = scmp.lt.s32.totalorder %s3824_s29, %s3824_s29 }
  0x34   : > { %p3827_p0 = pnand %p3825_p13, %p4144_p7 }
  0x35   : > { %p3834_p9 = por %p3833_p8, %p3832_p5 }
  0x36   : > { %p3828_p2 = pneg %p3827_p0 }
  0x37   : > { %3596 = dma.hbm_to_vmem [thread:$0]  (!%p4134_p6), %s5048_s7, 32, %s4138_s27, [#allocation9], %s5028_s17, %s5028_s17, %s5030_s12  }
  0x38   : > { %p3835_p10 = pnand %p3834_p9, %p3828_p2 }
  0x3a   : > { %3838 = shalt.err (!%p3835_p10)
}
  0x3b   : > { %s4004_s14 = smov 64   ;;  %s4005_s22 = smov 4  }
  0x3c   : > { %s5049_s3 = sld [smem:[#allocation21_spill]]  ;;  %s4006_s27 = smov [#allocation10]  }
  0x3d   : > { %s451_s15 = sshll.u32 %s4006_s27, 4  ;;  %s4007_s23 = smov [#allocation11]   ;;  %s452_s15 = int_to_ptr.vmem [resolvable:$true] %s451_s15 }
  0x3e   : > { %s467_s17 = sshll.u32 %s4007_s23, 4  ;;  %s3850_s12 = scalar_lea.vmem %s452_s15, 32  ;;  %s468_s17 = int_to_ptr.vmem [resolvable:$true] %s467_s17 }
  0x3f   : > { %p3851_p11 = scmp.ne.s32.totalorder %s452_s15, %s3850_s12  ;;  %p3858_p0 = scmp.lt.s32.totalorder %s452_s15, %s452_s15 }
  0x40   : > { %p3859_p2 = scmp.lt.s32.totalorder %s3850_s12, %s3850_s12 }
  0x41   : > { %p3853_p12 = pnand %p3851_p11, %p4144_p7 }
  0x42   : > { %3593 = dma.hbm_to_vmem [thread:$0]  (!%p4134_p6), %s5049_s3, 128, %s414_s30, [#allocation6], %s4004_s14, %s4004_s14, %s4005_s22  }
  0x43   : > { %p3854_p13 = pneg %p3853_p12  ;;  %p3860_p5 = por %p3859_p2, %p3858_p0 }
  0x45   : > { %p3861_p8 = pnand %p3860_p5, %p3854_p13 }
  0x47   : > { %3864 = shalt.err (!%p3861_p8)
}
  0x48   : > { %s5050_s29 = smov 1   ;;  %s5051_s2 = smov 16  }
  0x49   : > { %s5052_s9 = sld [smem:[#allocation23_spill]]  ;;  %s3876_s26 = scalar_lea.vmem %s468_s17, 32 }
  0x4a   : > { %p3877_p9 = scmp.ne.s32.totalorder %s468_s17, %s3876_s26  ;;  %p3884_p12 = scmp.lt.s32.totalorder %s468_s17, %s468_s17 }
  0x4b   : > { %p3885_p0 = scmp.lt.s32.totalorder %s3876_s26, %s3876_s26 }
  0x4c   : > { %p3879_p10 = pnand %p3877_p9, %p4144_p7 }
  0x4d   : > { %p3886_p13 = por %p3885_p0, %p3884_p12 }
  0x4e   : > { %p3880_p11 = pneg %p3879_p10 }
  0x4f   : > { %3599 = dma.hbm_to_vmem [thread:$0]  (!%p4134_p6), %s5052_s9, 32, %s452_s15, [#allocation9], %s5051_s2, %s5051_s2, %s5050_s29  }
  0x50   : > { %p3887_p2 = pnand %p3886_p13, %p3880_p11 }
  0x52   : > { %3890 = shalt.err (!%p3887_p2)
}
  0x53   : > { %s5053_s11 = sld [smem:[#allocation24_spill]]  ;;  %s3013_s28 = sadd.s32 4294967294, %s3995_s21  }
  0x54   : > { %s4203_s16 = sadd.s32 1, %s3995_s21   ;;  %s41_s27 = sadd.s32 1, %s3991_s20 }
  0x55   : > { %s38_s15 = ssub.s32 %s3995_s21, %s4203_s16  ;;  %p48_p7 = scmp.ne.s32.totalorder %s3991_s20, %s3987_s19 }
  0x56   : > { %p39_p5 = scmp.eq.s32.totalorder %s38_s15, 0  ;;  %p49_p8 = scmp.eq.s32.totalorder %s3995_s21, 0 }
  0x57   : > { %p54_p9 = scmp.ne.s32.totalorder %s3987_s19, %s3983_s18  ;;  %p372_p10 = scmp.eq.s32.totalorder %s4120_s24, 1 }
  0x58   : > { %s4215_s23 = scalar_select %p39_p5, %s3991_s20, %s41_s27  }
  0x59   : > { %3602 = dma.hbm_to_vmem [thread:$0]  (!%p4134_p6), %s5053_s11, 32, %s468_s17, [#allocation12], %s5051_s2, %s5051_s2, %s5050_s29  }
  0x5a   : > { %5054 = sst [smem:[#allocation19_spill]] %s4215_s23  ;;  %p50_p11 = por %p49_p8, %p48_p7 }
  0x5b   : > { %p4219_p12 = por %p5032_p1, %p54_p9  ;;  %p4223_p6 = por %p372_p10, %p48_p7 }
  0x5c   : > { %p378_p0 = scmp.eq.s32.totalorder %s3013_s28, 1  ;;  %p3616_p13 = scmp.lt.s32.totalorder %s3995_s21, 2 }
  0x5d   : > { %s5055_s30 = scalar_select %p4219_p12, 1, 0 }
  0x5e   : > { %s5056_s17 = scalar_select %p4223_p6, 1, 0 }
  0x5f   : > { %s490_s29 = sand.u32 1, %s3991_s20   ;;  %p4229_p2 = por %p378_p0, %p54_p9 }
  0x60   : > { %s3560_s22 = smul.u32 24, %s490_s29  ;;  %p4233_p5 = pnand %p3616_p13, %p50_p11 }
  0x61   : > { %s5057_s2 = scalar_select %p4229_p2, 1, 0 }
  0x62   : > { %s3561_s12 = smul.u32 384, %s3995_s21  ;;  %s494_s28 = scalar_lea.vmem [#allocation2], %s3560_s22 }
  0x63   : > { %s501_s3 = sshll.u32 %s494_s28, 4  ;;  %s4245_s7 = scalar_lea.sflag [#allocation3], %s490_s29  ;;  %s4243_s3 = int_to_ptr.vmem [resolvable:$true] %s501_s3 }
  0x64   : > { %s4241_s15 = scalar_lea.hbm %s5009_s0, %s3561_s12  ;;  %p3893_p8 = pneg %p4233_p5 }
  0x65   : > { %s3891_s9 = scalar_lea.hbm %s4241_s15, 384  ;;  %s3896_s12 = scalar_lea.hbm %s5009_s0, 768 }
  0x66   : > { %p3892_p7 = scmp.ne.s32.totalorder %s4241_s15, %s3891_s9  ;;  %p3897_p11 = scmp.lt.s32.totalorder %s4241_s15, %s5009_s0 }
  0x67   : > { %p3898_p0 = scmp.lt.s32.totalorder %s3896_s12, %s3891_s9 }
  0x68   : > { %p3894_p9 = pnand %p3893_p8, %p3892_p7 }
  0x69   : > { %p3899_p13 = por %p3898_p0, %p3897_p11 }
  0x6a   : > { %p3895_p10 = pneg %p3894_p9 }
  0x6c   : > { %p3900_p4 = pnand %p3899_p13, %p3895_p10 }
  0x6e   : > { %3903 = shalt.err (!%p3900_p4)
}
  0x6f   : > { %s3904_s29 = scalar_lea.vmem %s4243_s3, 384  ;;  %s4008_s22 = smov [#allocation2]  }
  0x70   : > { %p3905_p1 = scmp.ne.s32.totalorder %s4243_s3, %s3904_s29  ;;  %s3909_s28 = sshll.u32 %s4008_s22, 4  ;;  %s3910_s28 = int_to_ptr.vmem [resolvable:$false] %s3909_s28 }
  0x71   : > { %s3911_s11 = scalar_lea.vmem %s3910_s28, 768  ;;  %p3912_p9 = scmp.lt.s32.totalorder %s4243_s3, %s3910_s28 }
  0x72   : > { %p3907_p2 = pnand %p3905_p1, %p3893_p8  ;;  %p3913_p6 = scmp.lt.s32.totalorder %s3911_s11, %s3904_s29 }
  0x74   : > { %p3908_p7 = pneg %p3907_p2  ;;  %p3914_p12 = por %p3913_p6, %p3912_p9 }
  0x76   : > { %p3915_p3 = pnand %p3914_p12, %p3908_p7 }
  0x78   : > { %3918 = shalt.err (!%p3915_p3)
}
  0x79   : > { %s5059_s9 = smov 8   ;;  %s5060_s23 = smov 128  }
  0x7a   : > { %3606 = dma.hbm_to_vmem [thread:$0]  (!%p4233_p5), %s4241_s15, 384, %s4243_s3, %s4245_s7, %s5060_s23, %s5060_s23, %s5059_s9  }
  0x7b   : > { %p5061_p1 = scmp.ne.s32.totalorder %s5044_s25, 0 }
  0x7c   : > { %s4272_s12 = sand.u32 (!%p5061_p1), 1, %s3987_s19   ;;  %p5062_p3 = scmp.ne.s32.totalorder (!%p5061_p1), %s5055_s30, 0 }
  0x7d   : > { %513 = sbr.rel (%p5061_p1) target bundleno = 5667 (0x1623), region = 80  ;;  %s516_s27 = scalar_lea.sflag (!%p5061_p1), [#allocation3], %s4272_s12 }
  0x7e   : > { %s3562_s14 = smul.u32 (!%p5061_p1), 24, %s4272_s12 }
  0x80   : > { %s4276_s29 = scalar_lea.vmem (!%p5061_p1), [#allocation2], %s3562_s14 }
  0x82   : > { %3962 = dma.done.wait (%p5062_p3), %s516_s27, 384  }
  0x83   : > { %3964 = vsyncadd (%p5062_p3), %s516_s27, 4294966912  ;;  %p5063_p4 = scmp.eq.s32.totalorder %s4120_s24, 0 }
  0x85   : > { %3966 = dma.done.wait (%p5063_p4), [#allocation6], 512   ;;  %p5064_p12 = pmov %p5063_p4 }
  0x86   : > { %p5065_p6 = pmov %p5063_p4 }
  0x87   : > { %3968 = vsyncadd (%p5064_p12), [#allocation6], 4294966784 }
  0x88   : > { %3970 = dma.done.wait (%p5065_p6), [#allocation9], 64   ;;  %p5066_p2 = pmov %p5063_p4 }
  0x8a   : > { %3972 = vsyncadd (%p5066_p2), [#allocation9], 4294967232  ;;  %p5067_p5 = pmov %p5066_p2 }
  0x8b   : > { %p5068_p8 = pmov %p5066_p2 }
  0x8c   : > { %3974 = dma.done.wait (%p5067_p5), [#allocation12], 32  }
  0x8d   : > { %3976 = vsyncadd (%p5068_p8), [#allocation12], 4294967264  ;;  %v4009_v0 = vmov 0.0   ;;  %vm4010_vm0 = vmmov 0   ;;  %v593_v1 = vld [vmem:[%s5010_s1 + $0x28] sm:$0xff]  ;;  %v592_v2 = vld [vmem:[%s5010_s1 + $0x20] sm:$0xff]  ;;  %v687_v49 = vlaneseq }
  0x8e   : > { %3250 = vmatprep.subr.mxu0 %v4009_v0  ;;  %3262 = vmatprep.mubr.msk.f32.mxu0 %vm4010_vm0, %v4009_v0  ;;  %v591_v3 = vld [vmem:[%s5010_s1 + $0x18] sm:$0xff]  ;;  %v590_v4 = vld [vmem:[%s5010_s1 + $0x10] sm:$0xff]  ;;  %v589_v5 = vld [vmem:[%s5010_s1 + $0x8] sm:$0xff]  ;;  %vm597_vm1 = vcmask 392192   ;;  %vm692_vm2 = vcmask 261120   ;;  %s4011_s11 = smov 96  }
  0x8f   : > { %3271 = vmatprep.subr.mxu1 %v4009_v0  ;;  %3279 = vmatprep.mubr.msk.f32.mxu1 %vm4010_vm0, %v4009_v0  ;;  %v588_v6 = vld [vmem:[%s5010_s1] sm:$0xff]  ;;  %v587_v9 = vld [vmem:[%s4276_s29 + $0x10] sm:$0xff]  ;;  %v595_v14 = vld [vmem:[#allocation5 + $0x8] sm:$0xff]  ;;  %v4368_v53 = vshrl.u32 %v687_v49, 7  ;;  %s4012_s9 = smov 80   ;;  %s4013_s23 = smov 112  }
  0x90   : > { %3251 = vmatpush3.msra.mxu0 %v593_v1  ;;  %v585_v7 = vld [vmem:[%s4276_s29] sm:$0xff]  ;;  %v586_v8 = vld [vmem:[%s4276_s29 + $0x8] sm:$0xff]  ;;  %v594_v10 = vld [vmem:[#allocation5] sm:$0xff]  ;;  %vm856_vm3 = vcmask 130048   ;;  %vm955_vm5 = vcmask 195584   ;;  %s4015_s14 = smov 64  }
  0x91   : > { %3252 = vmatprep.subr.mxu0 %v4009_v0  ;;  %v596_v19 = vld [vmem:[#allocation5 + $0x10] sm:$0xff]  ;;  %v750_v40 = vld [vmem:[%s5013_s4 + $0x18] sm:$0xff]  ;;  %v749_v41 = vld [vmem:[%s5013_s4 + $0x10] sm:$0xff]  ;;  %v735_v55 = vsub.s32 0, %v4368_v53  ;;  %v742_v57 = vsub.s32 1, %v4368_v53  ;;  %s4016_s27 = smov 48  }
  0x92   : > { %3253 = vmatpush3.msra.mxu0 %v592_v2  ;;  %3272 = vmatpush3.msra.mxu1 %v750_v40  ;;  %v748_v42 = vld [vmem:[%s5013_s4 + $0x8] sm:$0xff]  ;;  %v747_v43 = vld [vmem:[%s5013_s4] sm:$0xff]  ;;  %s4017_s28 = smov 16   ;;  %vm1637_vm6 = vcmask 523264   ;;  %vm2788_vm7 = vcmask 253952   ;;  %s584_s7 = scalar_lea.vmem [#allocation13], %s4272_s12 }
  0x93   : > { %3254 = vmatprep.subr.mxu0 %v4009_v0  ;;  %3273 = vmatprep.subr.mxu1 %v4009_v0  ;;  %v4371_v56 = vld [vmem:[#allocation7] sm:$0xf]  ;;  %s2899_s25 = sshll.u32 %s584_s7, 4  ;;  %s5071_s15 = sld [smem:[#allocation27_spill]]  ;;  %s2900_s25 = int_to_ptr.vmem [resolvable:$true] %s2899_s25 }
  0x94   : > { %3255 = vmatpush3.msra.mxu0 %v591_v3  ;;  %3274 = vmatpush3.msra.mxu1 %v749_v41  ;;  %v736_v58 = vrot.slane %v4371_v56, %v735_v55  ;;  %v743_v61 = vrot.slane %v4371_v56, %v742_v57  ;;  %s2887_s29 = scalar_lea.sflag [#allocation4], %s4272_s12  ;;  %s3919_s3 = scalar_lea.vmem %s2900_s25, 16 }
  0x95   : > { %3256 = vmatprep.subr.mxu0 %v4009_v0  ;;  %3275 = vmatprep.subr.mxu1 %v4009_v0  ;;  %p3920_p10 = scmp.ne.s32.totalorder %s2900_s25, %s3919_s3  ;;  %p5072_p11 = scmp.ne.s32.totalorder %s5056_s17, 0 }
  0x96   : > { %3257 = vmatpush3.msra.mxu0 %v590_v4  ;;  %3276 = vmatpush3.msra.mxu1 %v748_v42 }
  0x97   : > { %3258 = vmatprep.subr.mxu0 %v4009_v0  ;;  %3277 = vmatprep.subr.mxu1 %v4009_v0  ;;  %p3921_p0 = pnand %p3920_p10, %p5072_p11 }
  0x98   : > { %3259 = vmatpush3.msra.mxu0 %v589_v5  ;;  %3278 = vmatpush3.msra.mxu1 %v747_v43 }
  0x99   : > { %3260 = vmatprep.subr.mxu0 %v4009_v0  ;;  %3288 = vmatprep.subr.mxu1 %v4009_v0  ;;  %p3922_p13 = pneg %p3921_p0 }
  0x9a   : > { %3261 = vmatpush3.msra.mxu0 %v588_v6 }
  0x9b   : > { %3263 = vmatmul.mubr.msk.f32.vlgmr.msra.gmra.mxu0 %vm597_vm1, %v585_v7  ;;  %3303 = vmatprep.subr.mxu0 %v4009_v0 }
  0x9c   : > { %3265 = vmatprep.mubr.msk.f32.mxu0 %vm4010_vm0, %v4009_v0 }
  0x9f   : > { %3266 = vmatmul.mubr.msk.f32.gmra.mxu0 %vm597_vm1, %v586_v8 }
  0xa0   : > { %3268 = vmatprep.mubr.msk.f32.mxu0 %vm4010_vm0, %v4009_v0 }
  0xa3   : > { %3269 = vmatmul.mubr.msk.f32.gmra.mxu0 %vm597_vm1, %v587_v9 }
  0xa4   : > { %3309 = vmatprep.mubr.msk.f32.mxu0 %vm4010_vm0, %v4009_v0 }
 0x15b   : > { %v673_v11 = vpop.f32.mrf.mxu0 }
 0x15c   : > { %v4333_v12 = vadd.f32 %v673_v11, %v594_v10  ;;  %v3031_v11 = vld [vmem:[%s5014_s5] ss:$0 sm:$0xff] }
 0x15d   : > { %v3264_v13 = vpop.f32.mrf.mxu0 }
 0x15e   : > { %v693_v15 = vsel %vm692_vm2, %v4333_v12, 0.0 }
 0x15f   : > { %694 = vadd.xlane.f32.xlu0 %v693_v15  ;;  %v678_v16 = vpop.f32.mrf.mxu0 }
 0x160   : > { %v4337_v17 = vadd.f32 %v678_v16, %v595_v14 }
 0x161   : > { %v3267_v18 = vpop.f32.mrf.mxu0 }
 0x162   : > { %v696_v20 = vsel %vm692_vm2, %v4337_v17, 0.0 }
 0x163   : > { %697 = vadd.xlane.f32.xlu0 %v696_v20  ;;  %v683_v21 = vpop.f32.mrf.mxu0 }
 0x164   : > { %v4341_v22 = vadd.f32 %v683_v21, %v596_v19 }
 0x165   : > { %v3270_v23 = vpop.f32.mrf.mxu0 }
 0x166   : > { %v699_v24 = vsel %vm692_vm2, %v4341_v22, 0.0 }
 0x167   : > { %700 = vadd.xlane.f32.xlu1 %v699_v24 }
 0x1e8   : > { %v695_v25 = vpop.xlane.xlu0 %694 }
 0x1e9   : > { %v703_v26 = vmul.f32 0.03125, %v695_v25 }
 0x1eb   : > { %v706_v27 = vsub.f32 %v4333_v12, %v703_v26 }
 0x1ec   : > { %v698_v28 = vpop.xlane.xlu0 %697 }
 0x1ed   : > { %v704_v29 = vmul.f32 0.03125, %v698_v28  ;;  %v709_v30 = vmul.f32 %v706_v27, %v706_v27 }
 0x1ef   : > { %v707_v31 = vsub.f32 %v4337_v17, %v704_v29  ;;  %v712_v32 = vsel %vm692_vm2, %v709_v30, 0.0 }
 0x1f0   : > { %713 = vadd.xlane.f32.xlu1 %v712_v32  ;;  %v701_v33 = vpop.xlane.xlu1 %700  ;;  %v4014_v32 = vmov -1e+30  }
 0x1f1   : > { %v705_v34 = vmul.f32 0.03125, %v701_v33  ;;  %v710_v35 = vmul.f32 %v707_v31, %v707_v31 }
 0x1f3   : > { %v708_v36 = vsub.f32 %v4341_v22, %v705_v34  ;;  %v715_v37 = vsel %vm692_vm2, %v710_v35, 0.0 }
 0x1f4   : > { %716 = vadd.xlane.f32.xlu0 %v715_v37 }
 0x1f5   : > { %v711_v38 = vmul.f32 %v708_v36, %v708_v36 }
 0x1f7   : > { %v718_v39 = vsel %vm692_vm2, %v711_v38, 0.0 }
 0x1f8   : > { %719 = vadd.xlane.f32.xlu1 %v718_v39 }
 0x279   : > { %v714_v44 = vpop.xlane.xlu1 %713 }
 0x27a   : > { %v721_v45 = vmul.f32 0.03125, %v714_v44 }
 0x27c   : > { %v724_v46 = vadd.f32 1e-12, %v721_v45 }
 0x27d   : > { %v717_v47 = vpop.xlane.xlu0 %716 }
 0x27e   : > { %3675 = vrsqrt.f32 %v724_v46  ;;  %v722_v48 = vmul.f32 0.03125, %v717_v47 }
 0x280   : > { %v725_v50 = vadd.f32 1e-12, %v722_v48 }
 0x281   : > { %v720_v51 = vpop.xlane.xlu1 %719 }
 0x282   : > { %3677 = vrsqrt.f32 %v725_v50  ;;  %v723_v52 = vmul.f32 0.03125, %v720_v51 }
 0x284   : > { %v726_v54 = vadd.f32 1e-12, %v723_v52 }
 0x286   : > { %3679 = vrsqrt.f32 %v726_v54 }
 0x28b   : > { %v3676_v59 = vpop.eup %3675 }
 0x28c   : > { %v730_v60 = vmul.f32 %v3676_v59, %v706_v27 }
 0x28e   : > { %v737_v62 = vmul.f32 %v736_v58, %v730_v60 }
 0x28f   : > { %v3678_v63 = vpop.eup %3677 }
 0x290   : > { %v744_v1 = vadd.f32 %v743_v61, %v737_v62  ;;  %v731_v2 = vmul.f32 %v3678_v63, %v707_v31  ;;  %v688_v31 = vand.u32 127, %v687_v49 }
 0x292   : > { %3280 = vmatmul.mubr.msk.f32.vlgmr.msra.gmra.mxu1 %vm692_vm2, %v744_v1  ;;  %v738_v3 = vmul.f32 %v736_v58, %v731_v2  ;;  %vm689_vm4 = vcmp.lt.s32.totalorder %v688_v31, 17 }
 0x293   : > { %v3680_v4 = vpop.eup %3679  ;;  %3282 = vmatprep.mubr.msk.f32.mxu1 %vm4010_vm0, %v4009_v0  ;;  %v4450_v33 = vsel %vm689_vm4, 0.0, %v4014_v32 }
 0x294   : > { %v745_v5 = vadd.f32 %v743_v61, %v738_v3  ;;  %v732_v6 = vmul.f32 %v3680_v4, %v708_v36 }
 0x296   : > { %3283 = vmatmul.mubr.msk.f32.gmra.mxu1 %vm692_vm2, %v745_v5  ;;  %v739_v7 = vmul.f32 %v736_v58, %v732_v6 }
 0x297   : > { %3285 = vmatprep.mubr.msk.f32.mxu1 %vm4010_vm0, %v4009_v0 }
 0x298   : > { %v746_v8 = vadd.f32 %v743_v61, %v739_v7 }
 0x29a   : > { %3286 = vmatmul.mubr.msk.f32.gmra.mxu1 %vm692_vm2, %v746_v8 }
 0x29b   : > { %3294 = vmatprep.mubr.msk.f32.mxu1 %vm4010_vm0, %v4009_v0 }
 0x352   : > { %v833_v9 = vpop.f32.mrf.mxu1 }
 0x353   : > { %v4396_v18 = vadd.f32 %v3031_v11, %v833_v9 }
 0x354   : > { %v3281_v10 = vpop.f32.mrf.mxu1 }
 0x356   : > { %v838_v13 = vpop.f32.mrf.mxu1 }
 0x357   : > { %v4392_v14 = vadd.f32 %v3031_v11, %v838_v13 }
 0x358   : > { %v3284_v15 = vpop.f32.mrf.mxu1 }
 0x359   : > { %852 = vrot.lane.b32.xlu1 %v4392_v14, %s4011_s11 }
 0x35a   : > { %v843_v16 = vpop.f32.mrf.mxu1 }
 0x35b   : > { %v4398_v19 = vadd.f32 %v3031_v11, %v843_v16 }
 0x35c   : > { %v3287_v20 = vpop.f32.mrf.mxu1 }
 0x35d   : > { %850 = vrot.lane.b32.xlu1 %v4396_v18, %s4011_s11  ;;  %854 = vrot.lane.b32.xlu0 %v4398_v19, %s4011_s11 }
 0x361   : > { %1097 = vrot.lane.b32.xlu1 %v4398_v19, %s4012_s9  ;;  %1095 = vrot.lane.b32.xlu0 %v4392_v14, %s4012_s9 }
 0x365   : > { %1093 = vrot.lane.b32.xlu1 %v4396_v18, %s4012_s9  ;;  %1087 = vrot.lane.b32.xlu0 %v4396_v18, %s4013_s23 }
 0x369   : > { %1089 = vrot.lane.b32.xlu1 %v4392_v14, %s4013_s23  ;;  %1091 = vrot.lane.b32.xlu0 %v4398_v19, %s4013_s23 }
 0x3cb   : > { %v853_v21 = vpop.permute.xlu1 %852 }
 0x3cf   : > { %v855_v23 = vpop.permute.xlu0 %854  ;;  %v851_v24 = vpop.permute.xlu1 %850 }
 0x3d0   : > { %3289 = vmatpush3.xpose.msk.msra.mxu1 %vm856_vm3, %v855_v23 }
 0x3d1   : > { %3290 = vmatprep.subr.mxu1 %v4009_v0 }
 0x3d3   : > { %v1098_v25 = vpop.permute.xlu1 %1097  ;;  %v1096_v26 = vpop.permute.xlu0 %1095 }
 0x3d4   : > { %3291 = vmatpush3.xpose.msk.msra.mxu1 %vm856_vm3, %v853_v21 }
 0x3d5   : > { %3292 = vmatprep.subr.mxu1 %v4009_v0 }
 0x3d7   : > { %v1094_v27 = vpop.permute.xlu1 %1093  ;;  %v1088_v28 = vpop.permute.xlu0 %1087 }
 0x3d8   : > { %3293 = vmatpush3.xpose.msk.msra.mxu1 %vm856_vm3, %v851_v24 }
 0x3d9   : > { %3318 = vmatprep.subr.mxu1 %v4009_v0 }
 0x3db   : > { %3295 = vmatmul.mubr.msk.f32.vlgmr.msra.gmra.mxu1 %vm856_vm3, %v4396_v18  ;;  %v1090_v29 = vpop.permute.xlu1 %1089  ;;  %v1092_v30 = vpop.permute.xlu0 %1091 }
 0x3dc   : > { %3319 = vmatpush3.xpose.msk.msra.mxu1 %vm856_vm3, %v1098_v25  ;;  %3297 = vmatprep.mubr.msk.f32.mxu1 %vm4010_vm0, %v4009_v0 }
 0x3dd   : > { %3320 = vmatprep.subr.mxu1 %v4009_v0 }
 0x3df   : > { %3298 = vmatmul.mubr.msk.f32.gmra.mxu1 %vm856_vm3, %v4392_v14 }
 0x3e0   : > { %3321 = vmatpush3.xpose.msk.msra.mxu1 %vm856_vm3, %v1096_v26  ;;  %3300 = vmatprep.mubr.msk.f32.mxu1 %vm4010_vm0, %v4009_v0 }
 0x3e1   : > { %3322 = vmatprep.subr.mxu1 %v4009_v0 }
 0x3e3   : > { %3301 = vmatmul.mubr.msk.f32.gmra.mxu1 %vm856_vm3, %v4398_v19 }
 0x3e4   : > { %3323 = vmatpush3.xpose.msk.msra.mxu1 %vm856_vm3, %v1094_v27  ;;  %3324 = vmatprep.mubr.msk.f32.mxu1 %vm4010_vm0, %v4009_v0 }
 0x3e5   : > { %3554 = vmatprep.subr.mxu1 %v4009_v0 }
 0x3e7   : > { %3325 = vmatmul.mubr.msk.f32.vlgmr.msra.gmra.mxu1 %vm856_vm3, %v1088_v28 }
 0x3e8   : > { %3327 = vmatprep.mubr.msk.f32.mxu1 %vm4010_vm0, %v4009_v0 }
 0x3eb   : > { %3328 = vmatmul.mubr.msk.f32.gmra.mxu1 %vm856_vm3, %v1090_v29 }
 0x3ec   : > { %3330 = vmatprep.mubr.msk.f32.mxu1 %vm4010_vm0, %v4009_v0 }
 0x3ef   : > { %3331 = vmatmul.mubr.msk.f32.gmra.mxu1 %vm856_vm3, %v1092_v30 }
 0x3f0   : > { %3345 = vmatprep.mubr.msk.f32.mxu1 %vm4010_vm0, %v4009_v0 }
 0x49b   : > { %v935_v34 = vpop.f32.mrf.mxu1 }
 0x49c   : > { %v949_v35 = vmul.f32 0.25, %v935_v34 }
 0x49d   : > { %v3296_v36 = vpop.f32.mrf.mxu1 }
 0x49e   : > { %v952_v37 = vadd.f32 %v949_v35, %v4450_v33 }
 0x49f   : > { %v940_v38 = vpop.f32.mrf.mxu1 }
 0x4a0   : > { %v950_v39 = vmul.f32 0.25, %v940_v38  ;;  %v956_v40 = vsel %vm955_vm5, %v952_v37, -inf }
 0x4a1   : > { %957 = vmax.xlane.f32.xlu1 %v956_v40  ;;  %v3299_v41 = vpop.f32.mrf.mxu1 }
 0x4a2   : > { %v953_v42 = vadd.f32 %v950_v39, %v4450_v33 }
 0x4a3   : > { %v945_v43 = vpop.f32.mrf.mxu1 }
 0x4a4   : > { %v951_v44 = vmul.f32 0.25, %v945_v43  ;;  %v959_v45 = vsel %vm955_vm5, %v953_v42, -inf }
 0x4a5   : > { %960 = vmax.xlane.f32.xlu0 %v959_v45  ;;  %v3302_v46 = vpop.f32.mrf.mxu1 }
 0x4a6   : > { %v954_v47 = vadd.f32 %v951_v44, %v4450_v33 }
 0x4a7   : > { %v1177_v48 = vpop.f32.mrf.mxu1 }
 0x4a8   : > { %v1191_v49 = vmul.f32 0.25, %v1177_v48  ;;  %v962_v50 = vsel %vm955_vm5, %v954_v47, -inf }
 0x4a9   : > { %963 = vmax.xlane.f32.xlu0 %v962_v50  ;;  %v3326_v51 = vpop.f32.mrf.mxu1 }
 0x4aa   : > { %v1194_v52 = vadd.f32 %v1191_v49, %v4450_v33 }
 0x4ab   : > { %v1182_v54 = vpop.f32.mrf.mxu1 }
 0x4ac   : > { %v1192_v58 = vmul.f32 0.25, %v1182_v54  ;;  %v1197_v59 = vsel %vm955_vm5, %v1194_v52, -inf }
 0x4ad   : > { %1198 = vmax.xlane.f32.xlu0 %v1197_v59  ;;  %v3329_v60 = vpop.f32.mrf.mxu1 }
 0x4ae   : > { %v1195_v61 = vadd.f32 %v1192_v58, %v4450_v33 }
 0x4af   : > { %v1187_v62 = vpop.f32.mrf.mxu1 }
 0x4b0   : > { %v1193_v63 = vmul.f32 0.25, %v1187_v62  ;;  %v1200_v1 = vsel %vm955_vm5, %v1195_v61, -inf }
 0x4b1   : > { %1201 = vmax.xlane.f32.xlu1 %v1200_v1  ;;  %v3332_v2 = vpop.f32.mrf.mxu1 }
 0x4b2   : > { %v1196_v3 = vadd.f32 %v1193_v63, %v4450_v33 }
 0x4b4   : > { %v1203_v4 = vsel %vm955_vm5, %v1196_v3, -inf }
 0x4b5   : > { %1204 = vmax.xlane.f32.xlu0 %v1203_v4  ;;  %v1346_v4 = vld [vmem:[%s5015_s6 + $0x18] sm:$0xff] }
 0x4c2   : > { %993 = vrot.lane.b32.xlu1 %v4398_v19, %s4015_s14 }
 0x4c6   : > { %989 = vrot.lane.b32.xlu1 %v4396_v18, %s4015_s14 }
 0x4ca   : > { %1234 = vrot.lane.b32.xlu1 %v4398_v19, %s4016_s27 }
 0x4cb   : > { %991 = vrot.lane.b32.xlu0 %v4392_v14, %s4015_s14 }
 0x52a   : > { %v958_v5 = vpop.xlane.xlu1 %957 }
 0x52b   : > { %v965_v6 = vsub.f32 %v952_v37, %v958_v5  ;;  %v1345_v5 = vld [vmem:[%s5015_s6 + $0x10] sm:$0xff] }
 0x52d   : > { %v968_v7 = vmul.f32 1.442695, %v965_v6  ;;  %v1344_v6 = vld [vmem:[%s5015_s6 + $0x8] sm:$0xff] }
 0x52e   : > { %v961_v8 = vpop.xlane.xlu0 %960 }
 0x52f   : > { %3681 = vpow2.f32 %v968_v7  ;;  %v966_v9 = vsub.f32 %v953_v42, %v961_v8  ;;  %v1343_v8 = vld [vmem:[%s5015_s6] sm:$0xff] }
 0x531   : > { %v970_v10 = vmul.f32 1.442695, %v966_v9 }
 0x532   : > { %v964_v11 = vpop.xlane.xlu0 %963 }
 0x533   : > { %3683 = vpow2.f32 %v970_v10  ;;  %v967_v13 = vsub.f32 %v954_v47, %v964_v11 }
 0x535   : > { %v972_v15 = vmul.f32 1.442695, %v967_v13 }
 0x536   : > { %v1199_v16 = vpop.xlane.xlu0 %1198 }
 0x537   : > { %3685 = vpow2.f32 %v972_v15  ;;  %v1206_v20 = vsub.f32 %v1194_v52, %v1199_v16 }
 0x539   : > { %v1209_v21 = vmul.f32 1.442695, %v1206_v20 }
 0x53a   : > { %v1202_v23 = vpop.xlane.xlu1 %1201 }
 0x53b   : > { %3687 = vpow2.f32 %v1209_v21  ;;  %v1207_v19 = vsub.f32 %v1195_v61, %v1202_v23 }
 0x53c   : > { %v3682_v24 = vpop.eup %3681 }
 0x53d   : > { %v1211_v25 = vmul.f32 1.442695, %v1207_v19  ;;  %v974_v26 = vsel %vm955_vm5, %v3682_v24, 0.0 }
 0x53e   : > { %v1205_v27 = vpop.xlane.xlu0 %1204  ;;  %975 = vadd.xlane.f32.xlu1 %v974_v26  ;;  %v994_v28 = vpop.permute.xlu1 %993 }
 0x53f   : > { %3689 = vpow2.f32 %v1211_v25  ;;  %v1208_v29 = vsub.f32 %v1196_v3, %v1205_v27  ;;  %3304 = vmatpush3.msra.mxu0 %v994_v28 }
 0x540   : > { %v3684_v30 = vpop.eup %3683  ;;  %3305 = vmatprep.subr.mxu0 %v4009_v0 }
 0x541   : > { %v1213_v31 = vmul.f32 1.442695, %v1208_v29  ;;  %v977_v32 = vsel %vm955_vm5, %v3684_v30, 0.0 }
 0x542   : > { %978 = vadd.xlane.f32.xlu0 %v977_v32  ;;  %v992_v34 = vpop.permute.xlu0 %991  ;;  %v990_v35 = vpop.permute.xlu1 %989  ;;  %v3056_v32 = vld [vmem:[#allocation8] ss:$0 sm:$0xff] }
 0x543   : > { %3691 = vpow2.f32 %v1213_v31  ;;  %3306 = vmatpush3.msra.mxu0 %v992_v34 }
 0x544   : > { %v3686_v36 = vpop.eup %3685  ;;  %3307 = vmatprep.subr.mxu0 %v4009_v0 }
 0x545   : > { %3308 = vmatpush3.msra.mxu0 %v990_v35  ;;  %v980_v37 = vsel %vm955_vm5, %v3686_v36, 0.0 }
 0x546   : > { %981 = vadd.xlane.f32.xlu1 %v980_v37  ;;  %v1235_v38 = vpop.permute.xlu1 %1234  ;;  %3333 = vmatprep.subr.mxu0 %v4009_v0 }
 0x547   : > { %3557 = vmatpush3.msra.mxu1 %v1235_v38 }
 0x548   : > { %v3688_v39 = vpop.eup %3687  ;;  %3555 = vmatprep.subr.mxu1 %v4009_v0 }
 0x549   : > { %v1215_v40 = vsel %vm955_vm5, %v3688_v39, 0.0 }
 0x54a   : > { %1216 = vadd.xlane.f32.xlu0 %v1215_v40 }
 0x54c   : > { %v3690_v41 = vpop.eup %3689 }
 0x54d   : > { %v1218_v42 = vsel %vm955_vm5, %v3690_v41, 0.0 }
 0x54e   : > { %1219 = vadd.xlane.f32.xlu1 %v1218_v42 }
 0x550   : > { %v3692_v43 = vpop.eup %3691 }
 0x551   : > { %v1221_v44 = vsel %vm955_vm5, %v3692_v43, 0.0 }
 0x552   : > { %1222 = vadd.xlane.f32.xlu0 %v1221_v44 }
 0x55f   : > { %1232 = vrot.lane.b32.xlu1 %v4392_v14, %s4016_s27 }
 0x568   : > { %1230 = vrot.lane.b32.xlu0 %v4396_v18, %s4016_s27 }
 0x5c7   : > { %v976_v45 = vpop.xlane.xlu1 %975 }
 0x5c8   : > { %3693 = vrcp.f32 %v976_v45 }
 0x5cb   : > { %v979_v46 = vpop.xlane.xlu0 %978 }
 0x5cc   : > { %3695 = vrcp.f32 %v979_v46 }
 0x5cf   : > { %v982_v47 = vpop.xlane.xlu1 %981 }
 0x5d0   : > { %3697 = vrcp.f32 %v982_v47 }
 0x5d3   : > { %v1217_v48 = vpop.xlane.xlu0 %1216 }
 0x5d4   : > { %3699 = vrcp.f32 %v1217_v48 }
 0x5d5   : > { %v3694_v49 = vpop.eup %3693 }
 0x5d6   : > { %v986_v50 = vmul.f32 %v3694_v49, %v3682_v24 }
 0x5d7   : > { %v1220_v51 = vpop.xlane.xlu1 %1219 }
 0x5d8   : > { %3701 = vrcp.f32 %v1220_v51  ;;  %3310 = vmatmul.mubr.msk.f32.vlgmr.msra.gmra.mxu0 %vm955_vm5, %v986_v50 }
 0x5d9   : > { %v3696_v52 = vpop.eup %3695  ;;  %3334 = vmatpush3.msra.mxu0 %v1235_v38  ;;  %3312 = vmatprep.mubr.msk.f32.mxu0 %vm4010_vm0, %v4009_v0 }
 0x5da   : > { %3335 = vmatprep.subr.mxu0 %v4009_v0  ;;  %v987_v14 = vmul.f32 %v3696_v52, %v3684_v30 }
 0x5db   : > { %v1223_v18 = vpop.xlane.xlu0 %1222  ;;  %v1233_v54 = vpop.permute.xlu1 %1232 }
 0x5dc   : > { %3703 = vrcp.f32 %v1223_v18  ;;  %3313 = vmatmul.mubr.msk.f32.gmra.mxu0 %vm955_vm5, %v987_v14  ;;  %3558 = vmatpush3.msra.mxu1 %v1233_v54 }
 0x5dd   : > { %v3698_v58 = vpop.eup %3697  ;;  %3336 = vmatpush3.msra.mxu0 %v1233_v54  ;;  %3315 = vmatprep.mubr.msk.f32.mxu0 %vm4010_vm0, %v4009_v0 }
 0x5de   : > { %3337 = vmatprep.subr.mxu0 %v4009_v0  ;;  %3556 = vmatprep.subr.mxu1 %v4009_v0  ;;  %v988_v59 = vmul.f32 %v3698_v58, %v3686_v36 }
 0x5df   : > { %v1231_v60 = vpop.permute.xlu0 %1230 }
 0x5e0   : > { %3316 = vmatmul.mubr.msk.f32.gmra.mxu0 %vm955_vm5, %v988_v59  ;;  %3559 = vmatpush3.msra.mxu1 %v1231_v60 }
 0x5e1   : > { %v3700_v61 = vpop.eup %3699  ;;  %3338 = vmatpush3.msra.mxu0 %v1231_v60  ;;  %3339 = vmatprep.mubr.msk.f32.mxu0 %vm4010_vm0, %v4009_v0 }
 0x5e2   : > { %v1227_v62 = vmul.f32 %v3700_v61, %v3688_v39  ;;  %3348 = vmatprep.subr.mxu1 %v4009_v0  ;;  %3365 = vmatprep.subr.mxu0 %v4009_v0 }
 0x5e4   : > { %3340 = vmatmul.mubr.msk.f32.vlgmr.msra.gmra.mxu0 %vm955_vm5, %v1227_v62  ;;  %v1505_v62 = vld [vmem:[%s5017_s8 + $0x18] sm:$0xff] }
 0x5e5   : > { %v3702_v63 = vpop.eup %3701  ;;  %3342 = vmatprep.mubr.msk.f32.mxu0 %vm4010_vm0, %v4009_v0  ;;  %3366 = vmatpush3.msra.mxu0 %v1505_v62 }
 0x5e6   : > { %v1228_v1 = vmul.f32 %v3702_v63, %v3690_v41  ;;  %3367 = vmatprep.subr.mxu0 %v4009_v0  ;;  %v1504_v63 = vld [vmem:[%s5017_s8 + $0x10] sm:$0xff] }
 0x5e7   : > { %3368 = vmatpush3.msra.mxu0 %v1504_v63 }
 0x5e8   : > { %3343 = vmatmul.mubr.msk.f32.gmra.mxu0 %vm955_vm5, %v1228_v1  ;;  %v1503_v1 = vld [vmem:[%s5017_s8 + $0x8] sm:$0xff]  ;;  %3369 = vmatprep.subr.mxu0 %v4009_v0 }
 0x5e9   : > { %v3704_v2 = vpop.eup %3703  ;;  %3373 = vmatprep.mubr.msk.f32.mxu0 %vm4010_vm0, %v4009_v0  ;;  %3370 = vmatpush3.msra.mxu0 %v1503_v1 }
 0x5ea   : > { %v1229_v3 = vmul.f32 %v3704_v2, %v3692_v43  ;;  %v1502_v2 = vld [vmem:[%s5017_s8] sm:$0xff]  ;;  %3371 = vmatprep.subr.mxu0 %v4009_v0 }
 0x5eb   : > { %3372 = vmatpush3.msra.mxu0 %v1502_v2 }
 0x5ec   : > { %3346 = vmatmul.mubr.msk.f32.vlgmr.msra.gmra.mxu1 %vm955_vm5, %v1229_v3  ;;  %3407 = vmatprep.subr.mxu0 %v4009_v0 }
 0x5ed   : > { %3356 = vmatprep.mubr.msk.f32.mxu1 %vm4010_vm0, %v4009_v0  ;;  %3349 = vmatpush3.msra.mxu1 %v1346_v4 }
 0x5ee   : > { %3350 = vmatprep.subr.mxu1 %v4009_v0 }
 0x5ef   : > { %3351 = vmatpush3.msra.mxu1 %v1345_v5 }
 0x5f0   : > { %3352 = vmatprep.subr.mxu1 %v4009_v0 }
 0x5f1   : > { %3353 = vmatpush3.msra.mxu1 %v1344_v6 }
 0x5f2   : > { %3354 = vmatprep.subr.mxu1 %v4009_v0 }
 0x5f3   : > { %3355 = vmatpush3.msra.mxu1 %v1343_v8 }
 0x5f4   : > { %3382 = vmatprep.subr.mxu1 %v4009_v0 }
 0x698   : > { %v1073_v7 = vpop.f32.mrf.mxu0 }
 0x69a   : > { %v3311_v9 = vpop.f32.mrf.mxu0 }
 0x69c   : > { %v1078_v10 = vpop.f32.mrf.mxu0 }
 0x69e   : > { %v3314_v11 = vpop.f32.mrf.mxu0 }
 0x6a0   : > { %v1083_v13 = vpop.f32.mrf.mxu0 }
 0x6a2   : > { %v3317_v15 = vpop.f32.mrf.mxu0 }
 0x6a3   : > { %v1497_v15 = vsub.s32 3, %v4368_v53 }
 0x6a4   : > { %v1314_v16 = vpop.f32.mrf.mxu0 }
 0x6a5   : > { %1331 = vrot.lane.b32.xlu1 %v1314_v16, %s4017_s28 }
 0x6a6   : > { %v3341_v20 = vpop.f32.mrf.mxu0 }
 0x6a8   : > { %v1319_v21 = vpop.f32.mrf.mxu0 }
 0x6a9   : > { %1333 = vrot.lane.b32.xlu0 %v1319_v21, %s4017_s28  ;;  %v1498_v21 = vrot.slane %v4371_v56, %v1497_v15 }
 0x6aa   : > { %v3344_v23 = vpop.f32.mrf.mxu0 }
 0x6ac   : > { %v1324_v19 = vpop.f32.mrf.mxu1 }
 0x6ad   : > { %1335 = vrot.lane.b32.xlu1 %v1324_v19, %s4017_s28 }
 0x6ae   : > { %v3347_v24 = vpop.f32.mrf.mxu1 }
 0x717   : > { %v1332_v25 = vpop.permute.xlu1 %1331 }
 0x718   : > { %v1340_v26 = vsel %vm856_vm3, %v1073_v7, %v1332_v25 }
 0x719   : > { %3357 = vmatmul.mubr.msk.f32.vlgmr.msra.gmra.mxu1 %vm692_vm2, %v1340_v26 }
 0x71a   : > { %3359 = vmatprep.mubr.msk.f32.mxu1 %vm4010_vm0, %v4009_v0 }
 0x71b   : > { %v1334_v27 = vpop.permute.xlu0 %1333 }
 0x71c   : > { %v1341_v28 = vsel %vm856_vm3, %v1078_v10, %v1334_v27 }
 0x71d   : > { %3360 = vmatmul.mubr.msk.f32.gmra.mxu1 %vm692_vm2, %v1341_v28 }
 0x71e   : > { %3362 = vmatprep.mubr.msk.f32.mxu1 %vm4010_vm0, %v4009_v0 }
 0x71f   : > { %v1336_v29 = vpop.permute.xlu1 %1335 }
 0x720   : > { %v1342_v30 = vsel %vm856_vm3, %v1083_v13, %v1336_v29  ;;  %v1490_v13 = vsub.s32 2, %v4368_v53 }
 0x721   : > { %3363 = vmatmul.mubr.msk.f32.gmra.mxu1 %vm692_vm2, %v1342_v30 }
 0x722   : > { %3398 = vmatprep.mubr.msk.f32.mxu1 %vm4010_vm0, %v4009_v0  ;;  %v1491_v16 = vrot.slane %v4371_v56, %v1490_v13 }
 0x7d9   : > { %v1422_v31 = vpop.f32.mrf.mxu1 }
 0x7da   : > { %v1436_v34 = vadd.f32 %v1422_v31, %v4333_v12 }
 0x7db   : > { %v3358_v35 = vpop.f32.mrf.mxu1 }
 0x7dc   : > { %v4541_v36 = vadd.f32 %v3056_v32, %v1436_v34  ;;  %v1635_v34 = vld [vmem:[%s5019_s10 + $0x30] sm:$0xff]  ;;  %v1634_v35 = vld [vmem:[%s5019_s10 + $0x28] sm:$0xff] }
 0x7dd   : > { %v1427_v37 = vpop.f32.mrf.mxu1 }
 0x7de   : > { %v1437_v38 = vadd.f32 %v1427_v37, %v4337_v17  ;;  %v1449_v39 = vsel %vm692_vm2, %v4541_v36, 0.0  ;;  %v1633_v37 = vld [vmem:[%s5019_s10 + $0x20] sm:$0xff] }
 0x7df   : > { %1450 = vadd.xlane.f32.xlu0 %v1449_v39  ;;  %v3361_v40 = vpop.f32.mrf.mxu1  ;;  %v1631_v39 = vld [vmem:[%s5019_s10 + $0x10] sm:$0xff] }
 0x7e0   : > { %v4546_v41 = vadd.f32 %v3056_v32, %v1437_v38  ;;  %v1632_v38 = vld [vmem:[%s5019_s10 + $0x18] sm:$0xff]  ;;  %v1630_v40 = vld [vmem:[%s5019_s10 + $0x8] sm:$0xff] }
 0x7e1   : > { %v1432_v42 = vpop.f32.mrf.mxu1 }
 0x7e2   : > { %v1438_v43 = vadd.f32 %v1432_v42, %v4341_v22  ;;  %v1452_v44 = vsel %vm692_vm2, %v4546_v41, 0.0  ;;  %v1629_v42 = vld [vmem:[%s5019_s10] sm:$0xff] }
 0x7e3   : > { %1453 = vadd.xlane.f32.xlu1 %v1452_v44  ;;  %v3364_v12 = vpop.f32.mrf.mxu1 }
 0x7e4   : > { %v4551_v45 = vadd.f32 %v3056_v32, %v1438_v43  ;;  %v1636_v32 = vld [vmem:[%s5019_s10 + $0x38] sm:$0xff]  ;;  %v3057_v43 = vld [vmem:[#allocation10] ss:$0 sm:$0xff] }
 0x7e5   : > { %3383 = vmatpush3.msra.mxu1 %v1636_v32 }
 0x7e6   : > { %v1455_v17 = vsel %vm692_vm2, %v4551_v45, 0.0  ;;  %3384 = vmatprep.subr.mxu1 %v4009_v0 }
 0x7e7   : > { %1456 = vadd.xlane.f32.xlu0 %v1455_v17  ;;  %3385 = vmatpush3.msra.mxu1 %v1635_v34 }
 0x7e8   : > { %3386 = vmatprep.subr.mxu1 %v4009_v0 }
 0x7e9   : > { %3387 = vmatpush3.msra.mxu1 %v1634_v35 }
 0x7ea   : > { %3388 = vmatprep.subr.mxu1 %v4009_v0 }
 0x7eb   : > { %3389 = vmatpush3.msra.mxu1 %v1633_v37 }
 0x7ec   : > { %3390 = vmatprep.subr.mxu1 %v4009_v0 }
 0x7ed   : > { %3391 = vmatpush3.msra.mxu1 %v1632_v38 }
 0x7ee   : > { %3392 = vmatprep.subr.mxu1 %v4009_v0 }
 0x7ef   : > { %3393 = vmatpush3.msra.mxu1 %v1631_v39 }
 0x7f0   : > { %3394 = vmatprep.subr.mxu1 %v4009_v0 }
 0x7f1   : > { %3395 = vmatpush3.msra.mxu1 %v1630_v40 }
 0x7f2   : > { %3396 = vmatprep.subr.mxu1 %v4009_v0 }
 0x7f3   : > { %3397 = vmatpush3.msra.mxu1 %v1629_v42 }
 0x7f4   : > { %3439 = vmatprep.subr.mxu1 %v4009_v0 }
 0x868   : > { %v1451_v46 = vpop.xlane.xlu0 %1450 }
 0x869   : > { %v1458_v47 = vmul.f32 0.03125, %v1451_v46 }
 0x86b   : > { %v1461_v48 = vsub.f32 %v4541_v36, %v1458_v47 }
 0x86c   : > { %v1454_v49 = vpop.xlane.xlu1 %1453 }
 0x86d   : > { %v1459_v50 = vmul.f32 0.03125, %v1454_v49  ;;  %v1464_v51 = vmul.f32 %v1461_v48, %v1461_v48 }
 0x86f   : > { %v1462_v22 = vsub.f32 %v4546_v41, %v1459_v50  ;;  %v1467_v52 = vsel %vm692_vm2, %v1464_v51, 0.0 }
 0x870   : > { %1468 = vadd.xlane.f32.xlu0 %v1467_v52  ;;  %v1457_v14 = vpop.xlane.xlu0 %1456 }
 0x871   : > { %v1460_v18 = vmul.f32 0.03125, %v1457_v14  ;;  %v1465_v54 = vmul.f32 %v1462_v22, %v1462_v22 }
 0x873   : > { %v1463_v58 = vsub.f32 %v4551_v45, %v1460_v18  ;;  %v1470_v59 = vsel %vm692_vm2, %v1465_v54, 0.0 }
 0x874   : > { %1471 = vadd.xlane.f32.xlu0 %v1470_v59 }
 0x875   : > { %v1466_v60 = vmul.f32 %v1463_v58, %v1463_v58 }
 0x877   : > { %v1473_v61 = vsel %vm692_vm2, %v1466_v60, 0.0 }
 0x878   : > { %1474 = vadd.xlane.f32.xlu1 %v1473_v61 }
 0x8f9   : > { %v1469_v3 = vpop.xlane.xlu0 %1468 }
 0x8fa   : > { %v1476_v4 = vmul.f32 0.03125, %v1469_v3 }
 0x8fc   : > { %v1479_v5 = vadd.f32 1e-12, %v1476_v4 }
 0x8fd   : > { %v1472_v6 = vpop.xlane.xlu0 %1471 }
 0x8fe   : > { %3705 = vrsqrt.f32 %v1479_v5  ;;  %v1477_v7 = vmul.f32 0.03125, %v1472_v6 }
 0x900   : > { %v1480_v8 = vadd.f32 1e-12, %v1477_v7 }
 0x901   : > { %v1475_v9 = vpop.xlane.xlu1 %1474 }
 0x902   : > { %3707 = vrsqrt.f32 %v1480_v8  ;;  %v1478_v10 = vmul.f32 0.03125, %v1475_v9 }
 0x904   : > { %v1481_v11 = vadd.f32 1e-12, %v1478_v10 }
 0x906   : > { %3709 = vrsqrt.f32 %v1481_v11 }
 0x90b   : > { %v3706_v20 = vpop.eup %3705 }
 0x90c   : > { %v1485_v23 = vmul.f32 %v3706_v20, %v1461_v48 }
 0x90e   : > { %v1492_v19 = vmul.f32 %v1491_v16, %v1485_v23 }
 0x90f   : > { %v3708_v24 = vpop.eup %3707 }
 0x910   : > { %v1499_v25 = vadd.f32 %v1498_v21, %v1492_v19  ;;  %v1486_v26 = vmul.f32 %v3708_v24, %v1462_v22 }
 0x912   : > { %3374 = vmatmul.mubr.msk.f32.vlgmr.msra.gmra.mxu0 %vm692_vm2, %v1499_v25  ;;  %v1493_v27 = vmul.f32 %v1491_v16, %v1486_v26  ;;  %v3064_v25 = vld [vmem:[#allocation11] ss:$0 sm:$0xff] }
 0x913   : > { %v3710_v28 = vpop.eup %3709  ;;  %3376 = vmatprep.mubr.msk.f32.mxu0 %vm4010_vm0, %v4009_v0 }
 0x914   : > { %v1500_v29 = vadd.f32 %v1498_v21, %v1493_v27  ;;  %v1487_v30 = vmul.f32 %v3710_v28, %v1463_v58 }
 0x916   : > { %3377 = vmatmul.mubr.msk.f32.gmra.mxu0 %vm692_vm2, %v1500_v29  ;;  %v1494_v31 = vmul.f32 %v1491_v16, %v1487_v30 }
 0x917   : > { %3379 = vmatprep.mubr.msk.f32.mxu0 %vm4010_vm0, %v4009_v0 }
 0x918   : > { %v1501_v56 = vadd.f32 %v1498_v21, %v1494_v31 }
 0x91a   : > { %3380 = vmatmul.mubr.msk.f32.gmra.mxu0 %vm692_vm2, %v1501_v56 }
 0x91b   : > { %3415 = vmatprep.mubr.msk.f32.mxu0 %vm4010_vm0, %v4009_v0 }
 0x9d2   : > { %v1588_v44 = vpop.f32.mrf.mxu0 }
 0x9d3   : > { %v1589_v12 = vadd.f32 %v3057_v43, %v1588_v44 }
 0x9d4   : > { %v3375_v17 = vpop.f32.mrf.mxu0 }
 0x9d5   : > { %v1605_v46 = vmul.f32 0.044715, %v1589_v12  ;;  %v1602_v6 = vmul.f32 0.5, %v1589_v12 }
 0x9d6   : > { %v1593_v47 = vpop.f32.mrf.mxu0 }
 0x9d7   : > { %v1608_v48 = vmul.f32 %v1605_v46, %v1589_v12  ;;  %v1594_v49 = vadd.f32 %v3057_v43, %v1593_v47 }
 0x9d8   : > { %v3378_v50 = vpop.f32.mrf.mxu0 }
 0x9d9   : > { %v1611_v51 = vmul.f32 %v1608_v48, %v1589_v12  ;;  %v1606_v22 = vmul.f32 0.044715, %v1594_v49  ;;  %v1603_v10 = vmul.f32 0.5, %v1594_v49 }
 0x9da   : > { %v1598_v52 = vpop.f32.mrf.mxu0 }
 0x9db   : > { %v1614_v14 = vadd.f32 %v1611_v51, %v1589_v12  ;;  %v1609_v18 = vmul.f32 %v1606_v22, %v1594_v49  ;;  %v1599_v54 = vadd.f32 %v3057_v43, %v1598_v52  ;;  %v3068_v52 = vld [vmem:[%s5013_s4 + $0x38] sm:$0xff] }
 0x9dc   : > { %v3381_v58 = vpop.f32.mrf.mxu0  ;;  %3408 = vmatpush3.msra.mxu0 %v3068_v52 }
 0x9dd   : > { %v1617_v59 = vmul.f32 0.7978846, %v1614_v14  ;;  %v1612_v60 = vmul.f32 %v1609_v18, %v1594_v49  ;;  %v1607_v61 = vmul.f32 0.044715, %v1599_v54  ;;  %v1604_v21 = vmul.f32 0.5, %v1599_v54  ;;  %3409 = vmatprep.subr.mxu0 %v4009_v0  ;;  %v3067_v14 = vld [vmem:[%s5013_s4 + $0x30] sm:$0xff] }
 0x9de   : > { %3410 = vmatpush3.msra.mxu0 %v3067_v14  ;;  %v3066_v18 = vld [vmem:[%s5013_s4 + $0x28] sm:$0xff] }
 0x9df   : > { %3711 = vtanh.f32 %v1617_v59  ;;  %v1615_v62 = vadd.f32 %v1612_v60, %v1594_v49  ;;  %v1610_v63 = vmul.f32 %v1607_v61, %v1599_v54  ;;  %3411 = vmatprep.subr.mxu0 %v4009_v0 }
 0x9e0   : > { %3412 = vmatpush3.msra.mxu0 %v3066_v18 }
 0x9e1   : > { %v1613_v1 = vmul.f32 %v1610_v63, %v1599_v54  ;;  %v1618_v2 = vmul.f32 0.7978846, %v1615_v62  ;;  %3413 = vmatprep.subr.mxu0 %v4009_v0 }
 0x9e3   : > { %v1616_v3 = vadd.f32 %v1613_v1, %v1599_v54  ;;  %3713 = vtanh.f32 %v1618_v2  ;;  %v3065_v54 = vld [vmem:[%s5013_s4 + $0x20] sm:$0xff] }
 0x9e4   : > { %3414 = vmatpush3.msra.mxu0 %v3065_v54 }
 0x9e5   : > { %v1619_v4 = vmul.f32 0.7978846, %v1616_v3  ;;  %3424 = vmatprep.subr.mxu0 %v4009_v0 }
 0x9e7   : > { %3715 = vtanh.f32 %v1619_v4  ;;  %v4672_v4 = vld [vmem:[#allocation7 + $0x4] sm:$0xf] }
 0x9ec   : > { %v3712_v5 = vpop.eup %3711 }
 0x9ed   : > { %v1623_v7 = vadd.f32 1.0, %v3712_v5  ;;  %v1784_v5 = vrot.slane %v4672_v4, %v735_v55 }
 0x9ef   : > { %v1626_v8 = vmul.f32 %v1623_v7, %v1602_v6  ;;  %v1791_v7 = vrot.slane %v4672_v4, %v742_v57 }
 0x9f0   : > { %v3714_v9 = vpop.eup %3713 }
 0x9f1   : > { %3399 = vmatmul.mubr.msk.f32.vlgmr.msra.gmra.mxu1 %vm1637_vm6, %v1626_v8  ;;  %v1624_v11 = vadd.f32 1.0, %v3714_v9 }
 0x9f2   : > { %3401 = vmatprep.mubr.msk.f32.mxu1 %vm4010_vm0, %v4009_v0 }
 0x9f3   : > { %v1627_v16 = vmul.f32 %v1624_v11, %v1603_v10 }
 0x9f4   : > { %v3716_v20 = vpop.eup %3715 }
 0x9f5   : > { %3402 = vmatmul.mubr.msk.f32.gmra.mxu1 %vm1637_vm6, %v1627_v16  ;;  %v1625_v23 = vadd.f32 1.0, %v3716_v20 }
 0x9f6   : > { %3404 = vmatprep.mubr.msk.f32.mxu1 %vm4010_vm0, %v4009_v0 }
 0x9f7   : > { %v1628_v19 = vmul.f32 %v1625_v23, %v1604_v21 }
 0x9f9   : > { %3405 = vmatmul.mubr.msk.f32.gmra.mxu1 %vm1637_vm6, %v1628_v19 }
 0x9fa   : > { %3445 = vmatprep.mubr.msk.f32.mxu1 %vm4010_vm0, %v4009_v0 }
 0xab1   : > { %v1713_v24 = vpop.f32.mrf.mxu1 }
 0xab2   : > { %v1727_v26 = vadd.f32 %v1713_v24, %v4541_v36 }
 0xab3   : > { %v3400_v27 = vpop.f32.mrf.mxu1 }
 0xab4   : > { %v4636_v28 = vadd.f32 %v3064_v25, %v1727_v26  ;;  %v3070_v26 = vld [vmem:[%s5014_s5 + $0x1] ss:$0 sm:$0xff] }
 0xab5   : > { %v1718_v29 = vpop.f32.mrf.mxu1 }
 0xab6   : > { %v1728_v30 = vadd.f32 %v1718_v29, %v4546_v41  ;;  %v1742_v31 = vsel %vm692_vm2, %v4636_v28, 0.0 }
 0xab7   : > { %1743 = vadd.xlane.f32.xlu0 %v1742_v31  ;;  %v3403_v56 = vpop.f32.mrf.mxu1 }
 0xab8   : > { %v4641_v32 = vadd.f32 %v3064_v25, %v1728_v30 }
 0xab9   : > { %v1723_v34 = vpop.f32.mrf.mxu1 }
 0xaba   : > { %v1729_v35 = vadd.f32 %v1723_v34, %v4551_v45  ;;  %v1745_v37 = vsel %vm692_vm2, %v4641_v32, 0.0 }
 0xabb   : > { %1746 = vadd.xlane.f32.xlu1 %v1745_v37  ;;  %v3406_v36 = vpop.f32.mrf.mxu1 }
 0xabc   : > { %v4646_v38 = vadd.f32 %v3064_v25, %v1729_v35 }
 0xabe   : > { %v1748_v41 = vsel %vm692_vm2, %v4646_v38, 0.0 }
 0xabf   : > { %1749 = vadd.xlane.f32.xlu0 %v1748_v41 }
 0xb40   : > { %v1744_v39 = vpop.xlane.xlu0 %1743 }
 0xb41   : > { %v1751_v40 = vmul.f32 0.03125, %v1744_v39 }
 0xb43   : > { %v1754_v42 = vsub.f32 %v4636_v28, %v1751_v40 }
 0xb44   : > { %v1747_v43 = vpop.xlane.xlu1 %1746 }
 0xb45   : > { %v1752_v44 = vmul.f32 0.03125, %v1747_v43  ;;  %v1757_v12 = vmul.f32 %v1754_v42, %v1754_v42 }
 0xb47   : > { %v1755_v45 = vsub.f32 %v4641_v32, %v1752_v44  ;;  %v1760_v17 = vsel %vm692_vm2, %v1757_v12, 0.0 }
 0xb48   : > { %1761 = vadd.xlane.f32.xlu1 %v1760_v17  ;;  %v1750_v46 = vpop.xlane.xlu0 %1749 }
 0xb49   : > { %v1753_v47 = vmul.f32 0.03125, %v1750_v46  ;;  %v1758_v48 = vmul.f32 %v1755_v45, %v1755_v45 }
 0xb4b   : > { %v1756_v49 = vsub.f32 %v4646_v38, %v1753_v47  ;;  %v1763_v50 = vsel %vm692_vm2, %v1758_v48, 0.0 }
 0xb4c   : > { %1764 = vadd.xlane.f32.xlu0 %v1763_v50 }
 0xb4d   : > { %v1759_v51 = vmul.f32 %v1756_v49, %v1756_v49 }
 0xb4f   : > { %v1766_v22 = vsel %vm692_vm2, %v1759_v51, 0.0 }
 0xb50   : > { %1767 = vadd.xlane.f32.xlu1 %v1766_v22 }
 0xbd1   : > { %v1762_v58 = vpop.xlane.xlu1 %1761 }
 0xbd2   : > { %v1769_v59 = vmul.f32 0.03125, %v1762_v58 }
 0xbd4   : > { %v1772_v60 = vadd.f32 1e-12, %v1769_v59 }
 0xbd5   : > { %v1765_v61 = vpop.xlane.xlu0 %1764 }
 0xbd6   : > { %3717 = vrsqrt.f32 %v1772_v60  ;;  %v1770_v62 = vmul.f32 0.03125, %v1765_v61 }
 0xbd8   : > { %v1773_v63 = vadd.f32 1e-12, %v1770_v62 }
 0xbd9   : > { %v1768_v1 = vpop.xlane.xlu1 %1767 }
 0xbda   : > { %3719 = vrsqrt.f32 %v1773_v63  ;;  %v1771_v2 = vmul.f32 0.03125, %v1768_v1 }
 0xbdc   : > { %v1774_v3 = vadd.f32 1e-12, %v1771_v2 }
 0xbde   : > { %3721 = vrsqrt.f32 %v1774_v3 }
 0xbe3   : > { %v3718_v6 = vpop.eup %3717 }
 0xbe4   : > { %v1778_v8 = vmul.f32 %v3718_v6, %v1754_v42 }
 0xbe6   : > { %v1785_v9 = vmul.f32 %v1784_v5, %v1778_v8 }
 0xbe7   : > { %v3720_v10 = vpop.eup %3719 }
 0xbe8   : > { %v1792_v11 = vadd.f32 %v1791_v7, %v1785_v9  ;;  %v1779_v16 = vmul.f32 %v3720_v10, %v1755_v45 }
 0xbea   : > { %3416 = vmatmul.mubr.msk.f32.vlgmr.msra.gmra.mxu0 %vm692_vm2, %v1792_v11  ;;  %v1786_v20 = vmul.f32 %v1784_v5, %v1779_v16 }
 0xbeb   : > { %v3722_v21 = vpop.eup %3721  ;;  %3418 = vmatprep.mubr.msk.f32.mxu0 %vm4010_vm0, %v4009_v0 }
 0xbec   : > { %v1793_v23 = vadd.f32 %v1791_v7, %v1786_v20  ;;  %v1780_v19 = vmul.f32 %v3722_v21, %v1756_v49 }
 0xbee   : > { %3419 = vmatmul.mubr.msk.f32.gmra.mxu0 %vm692_vm2, %v1793_v23  ;;  %v1787_v55 = vmul.f32 %v1784_v5, %v1780_v19 }
 0xbef   : > { %3421 = vmatprep.mubr.msk.f32.mxu0 %vm4010_vm0, %v4009_v0 }
 0xbf0   : > { %v1794_v57 = vadd.f32 %v1791_v7, %v1787_v55 }
 0xbf2   : > { %3422 = vmatmul.mubr.msk.f32.gmra.mxu0 %vm692_vm2, %v1794_v57 }
 0xbf3   : > { %3430 = vmatprep.mubr.msk.f32.mxu0 %vm4010_vm0, %v4009_v0 }
 0xcaa   : > { %v1883_v24 = vpop.f32.mrf.mxu0 }
 0xcab   : > { %v4696_v56 = vadd.f32 %v3070_v26, %v1883_v24 }
 0xcac   : > { %v3417_v25 = vpop.f32.mrf.mxu0 }
 0xcae   : > { %v1888_v27 = vpop.f32.mrf.mxu0 }
 0xcaf   : > { %v4692_v29 = vadd.f32 %v3070_v26, %v1888_v27 }
 0xcb0   : > { %v3420_v30 = vpop.f32.mrf.mxu0 }
 0xcb1   : > { %1902 = vrot.lane.b32.xlu1 %v4692_v29, %s4011_s11 }
 0xcb2   : > { %v1893_v31 = vpop.f32.mrf.mxu0 }
 0xcb3   : > { %v4698_v34 = vadd.f32 %v3070_v26, %v1893_v31 }
 0xcb4   : > { %v3423_v35 = vpop.f32.mrf.mxu0 }
 0xcb5   : > { %1900 = vrot.lane.b32.xlu1 %v4696_v56, %s4011_s11  ;;  %1904 = vrot.lane.b32.xlu0 %v4698_v34, %s4011_s11  ;;  %s4018_s11 = smov [#allocation13]  }
 0xcb9   : > { %2145 = vrot.lane.b32.xlu1 %v4698_v34, %s4012_s9  ;;  %2143 = vrot.lane.b32.xlu0 %v4692_v29, %s4012_s9 }
 0xcbd   : > { %2141 = vrot.lane.b32.xlu1 %v4696_v56, %s4012_s9  ;;  %2135 = vrot.lane.b32.xlu0 %v4696_v56, %s4013_s23  ;;  %s5069_s9 = sld [smem:[#allocation25_spill]] }
 0xd23   : > { %v1903_v37 = vpop.permute.xlu1 %1902 }
 0xd27   : > { %v1905_v36 = vpop.permute.xlu0 %1904  ;;  %v1901_v41 = vpop.permute.xlu1 %1900 }
 0xd28   : > { %3425 = vmatpush3.xpose.msk.msra.mxu0 %vm856_vm3, %v1905_v36 }
 0xd29   : > { %3426 = vmatprep.subr.mxu0 %v4009_v0 }
 0xd2b   : > { %v2146_v39 = vpop.permute.xlu1 %2145  ;;  %v2144_v40 = vpop.permute.xlu0 %2143 }
 0xd2c   : > { %3427 = vmatpush3.xpose.msk.msra.mxu0 %vm856_vm3, %v1903_v37 }
 0xd2d   : > { %3428 = vmatprep.subr.mxu0 %v4009_v0 }
 0xd2f   : > { %v2142_v42 = vpop.permute.xlu1 %2141  ;;  %v2136_v43 = vpop.permute.xlu0 %2135 }
 0xd30   : > { %3429 = vmatpush3.xpose.msk.msra.mxu0 %vm856_vm3, %v1901_v41 }
 0xd31   : > { %3454 = vmatprep.subr.mxu0 %v4009_v0 }
 0xd33   : > { %3431 = vmatmul.mubr.msk.f32.vlgmr.msra.gmra.mxu0 %vm856_vm3, %v4696_v56 }
 0xd34   : > { %3455 = vmatpush3.xpose.msk.msra.mxu0 %vm856_vm3, %v2146_v39  ;;  %3433 = vmatprep.mubr.msk.f32.mxu0 %vm4010_vm0, %v4009_v0 }
 0xd35   : > { %3456 = vmatprep.subr.mxu0 %v4009_v0 }
 0xd37   : > { %3434 = vmatmul.mubr.msk.f32.gmra.mxu0 %vm856_vm3, %v4692_v29 }
 0xd38   : > { %3457 = vmatpush3.xpose.msk.msra.mxu0 %vm856_vm3, %v2144_v40  ;;  %3436 = vmatprep.mubr.msk.f32.mxu0 %vm4010_vm0, %v4009_v0 }
 0xd39   : > { %3458 = vmatprep.subr.mxu0 %v4009_v0 }
 0xd3b   : > { %3437 = vmatmul.mubr.msk.f32.gmra.mxu0 %vm856_vm3, %v4698_v34 }
 0xd3c   : > { %3459 = vmatpush3.xpose.msk.msra.mxu0 %vm856_vm3, %v2142_v42  ;;  %3460 = vmatprep.mubr.msk.f32.mxu0 %vm4010_vm0, %v4009_v0 }
 0xd3d   : > { %3484 = vmatprep.subr.mxu0 %v4009_v0 }
 0xd3f   : > { %3461 = vmatmul.mubr.msk.f32.vlgmr.msra.gmra.mxu0 %vm856_vm3, %v2136_v43 }
 0xd40   : > { %3463 = vmatprep.mubr.msk.f32.mxu0 %vm4010_vm0, %v4009_v0 }
 0xdf3   : > { %v1984_v44 = vpop.f32.mrf.mxu0 }
 0xdf4   : > { %v1998_v12 = vmul.f32 0.25, %v1984_v44 }
 0xdf5   : > { %v3432_v45 = vpop.f32.mrf.mxu0 }
 0xdf6   : > { %v2001_v17 = vadd.f32 %v1998_v12, %v4450_v33 }
 0xdf7   : > { %v1989_v46 = vpop.f32.mrf.mxu0 }
 0xdf8   : > { %v1999_v47 = vmul.f32 0.25, %v1989_v46  ;;  %v2004_v48 = vsel %vm955_vm5, %v2001_v17, -inf }
 0xdf9   : > { %2005 = vmax.xlane.f32.xlu1 %v2004_v48  ;;  %v3435_v49 = vpop.f32.mrf.mxu0 }
 0xdfa   : > { %v2002_v50 = vadd.f32 %v1999_v47, %v4450_v33 }
 0xdfb   : > { %v1994_v51 = vpop.f32.mrf.mxu0 }
 0xdfc   : > { %v2000_v22 = vmul.f32 0.25, %v1994_v51  ;;  %v2007_v52 = vsel %vm955_vm5, %v2002_v50, -inf }
 0xdfd   : > { %2008 = vmax.xlane.f32.xlu0 %v2007_v52  ;;  %v3438_v14 = vpop.f32.mrf.mxu0  ;;  %v3094_v52 = vld [vmem:[%s5015_s6 + $0x30] sm:$0xff] }
 0xdfe   : > { %v2003_v18 = vadd.f32 %v2000_v22, %v4450_v33  ;;  %v3095_v22 = vld [vmem:[%s5015_s6 + $0x38] sm:$0xff]  ;;  %v3093_v14 = vld [vmem:[%s5015_s6 + $0x28] sm:$0xff] }
 0xdff   : > { %v2225_v54 = vpop.f32.mrf.mxu0  ;;  %3485 = vmatpush3.msra.mxu0 %v3095_v22 }
 0xe00   : > { %v2239_v58 = vmul.f32 0.25, %v2225_v54  ;;  %v2010_v59 = vsel %vm955_vm5, %v2003_v18, -inf  ;;  %3486 = vmatprep.subr.mxu0 %v4009_v0 }
 0xe01   : > { %2011 = vmax.xlane.f32.xlu0 %v2010_v59  ;;  %v3462_v60 = vpop.f32.mrf.mxu0  ;;  %3487 = vmatpush3.msra.mxu0 %v3094_v52  ;;  %v3092_v59 = vld [vmem:[%s5015_s6 + $0x20] sm:$0xff] }
 0xe02   : > { %v2242_v61 = vadd.f32 %v2239_v58, %v4450_v33  ;;  %3488 = vmatprep.subr.mxu0 %v4009_v0 }
 0xe03   : > { %3489 = vmatpush3.msra.mxu0 %v3093_v14  ;;  %v4864_v14 = vrot.slane %v4672_v4, %v1490_v13 }
 0xe04   : > { %v2245_v62 = vsel %vm955_vm5, %v2242_v61, -inf  ;;  %3490 = vmatprep.subr.mxu0 %v4009_v0 }
 0xe05   : > { %2246 = vmax.xlane.f32.xlu0 %v2245_v62  ;;  %3491 = vmatpush3.msra.mxu0 %v3092_v59 }
 0xe06   : > { %3518 = vmatprep.subr.mxu0 %v4009_v0 }
 0xe0a   : > { %2041 = vrot.lane.b32.xlu1 %v4698_v34, %s4015_s14 }
 0xe0e   : > { %2037 = vrot.lane.b32.xlu1 %v4696_v56, %s4015_s14 }
 0xe12   : > { %2137 = vrot.lane.b32.xlu1 %v4692_v29, %s4013_s23 }
 0xe16   : > { %2282 = vrot.lane.b32.xlu1 %v4698_v34, %s4016_s27 }
 0xe1b   : > { %2039 = vrot.lane.b32.xlu0 %v4692_v29, %s4015_s14  ;;  %s5070_s14 = sld [smem:[#allocation26_spill]] }
 0xe1f   : > { %2280 = vrot.lane.b32.xlu0 %v4692_v29, %s4016_s27 }
 0xe82   : > { %v2006_v63 = vpop.xlane.xlu1 %2005 }
 0xe83   : > { %v2013_v1 = vsub.f32 %v2001_v17, %v2006_v63 }
 0xe85   : > { %v2016_v2 = vmul.f32 1.442695, %v2013_v1 }
 0xe86   : > { %v2042_v3 = vpop.permute.xlu1 %2041  ;;  %v2009_v5 = vpop.xlane.xlu0 %2008 }
 0xe87   : > { %3723 = vpow2.f32 %v2016_v2  ;;  %v2014_v6 = vsub.f32 %v2002_v50, %v2009_v5  ;;  %3440 = vmatpush3.msra.mxu1 %v2042_v3 }
 0xe88   : > { %3441 = vmatprep.subr.mxu1 %v4009_v0 }
 0xe89   : > { %v2018_v7 = vmul.f32 1.442695, %v2014_v6 }
 0xe8a   : > { %v2038_v8 = vpop.permute.xlu1 %2037  ;;  %v2012_v9 = vpop.xlane.xlu0 %2011 }
 0xe8b   : > { %3725 = vpow2.f32 %v2018_v7  ;;  %v2015_v10 = vsub.f32 %v2003_v18, %v2012_v9 }
 0xe8d   : > { %v2020_v11 = vmul.f32 1.442695, %v2015_v10 }
 0xe8e   : > { %v2138_v16 = vpop.permute.xlu1 %2137  ;;  %v2247_v20 = vpop.xlane.xlu0 %2246 }
 0xe8f   : > { %3727 = vpow2.f32 %v2020_v11  ;;  %v2254_v21 = vsub.f32 %v2242_v61, %v2247_v20  ;;  %3464 = vmatmul.mubr.msk.f32.gmra.mxu0 %vm856_vm3, %v2138_v16 }
 0xe90   : > { %3466 = vmatprep.mubr.msk.f32.mxu0 %vm4010_vm0, %v4009_v0 }
 0xe91   : > { %v2257_v23 = vmul.f32 1.442695, %v2254_v21 }
 0xe92   : > { %v2040_v19 = vpop.permute.xlu0 %2039  ;;  %v2283_v31 = vpop.permute.xlu1 %2282 }
 0xe93   : > { %3729 = vpow2.f32 %v2257_v23  ;;  %3442 = vmatpush3.msra.mxu1 %v2040_v19 }
 0xe94   : > { %v3724_v55 = vpop.eup %3723  ;;  %3443 = vmatprep.subr.mxu1 %v4009_v0 }
 0xe95   : > { %3444 = vmatpush3.msra.mxu1 %v2038_v8  ;;  %v2022_v57 = vsel %vm955_vm5, %v3724_v55, 0.0 }
 0xe96   : > { %2023 = vadd.xlane.f32.xlu1 %v2022_v57  ;;  %3469 = vmatprep.subr.mxu1 %v4009_v0  ;;  %v2281_v35 = vpop.permute.xlu0 %2280 }
 0xe98   : > { %v3726_v24 = vpop.eup %3725 }
 0xe99   : > { %v2025_v25 = vsel %vm955_vm5, %v3726_v24, 0.0 }
 0xe9a   : > { %2026 = vadd.xlane.f32.xlu0 %v2025_v25 }
 0xe9c   : > { %v3728_v26 = vpop.eup %3727 }
 0xe9d   : > { %v2028_v27 = vsel %vm955_vm5, %v3728_v26, 0.0 }
 0xe9e   : > { %2029 = vadd.xlane.f32.xlu1 %v2028_v27 }
 0xea0   : > { %v3730_v29 = vpop.eup %3729 }
 0xea1   : > { %v2263_v30 = vsel %vm955_vm5, %v3730_v29, 0.0 }
 0xea2   : > { %2264 = vadd.xlane.f32.xlu0 %v2263_v30 }
 0xeaf   : > { %2139 = vrot.lane.b32.xlu1 %v4698_v34, %s4013_s23 }
 0xeb8   : > { %2278 = vrot.lane.b32.xlu0 %v4696_v56, %s4016_s27  ;;  %s3121_s27 = sshll.u32 %s4120_s24, 4  ;;  %s3923_s24 = sshll.u32 %s4018_s11, 4  ;;  %s3924_s24 = int_to_ptr.vmem [resolvable:$false] %s3923_s24 }
 0xeb9   : > { %s4972_s22 = scalar_lea.hbm %s5071_s15, %s3121_s27  ;;  %p3926_p7 = scmp.lt.s32.totalorder %s2900_s25, %s3924_s24 }
 0xf1f   : > { %v2024_v37 = vpop.xlane.xlu1 %2023 }
 0xf20   : > { %3731 = vrcp.f32 %v2024_v37 }
 0xf23   : > { %v2027_v36 = vpop.xlane.xlu0 %2026 }
 0xf24   : > { %3733 = vrcp.f32 %v2027_v36 }
 0xf27   : > { %v2030_v41 = vpop.xlane.xlu1 %2029 }
 0xf28   : > { %3735 = vrcp.f32 %v2030_v41 }
 0xf2b   : > { %v2140_v39 = vpop.permute.xlu1 %2139  ;;  %v2265_v40 = vpop.xlane.xlu0 %2264 }
 0xf2c   : > { %3737 = vrcp.f32 %v2265_v40  ;;  %3467 = vmatmul.mubr.msk.f32.gmra.mxu0 %vm856_vm3, %v2140_v39 }
 0xf2d   : > { %v3732_v42 = vpop.eup %3731  ;;  %3492 = vmatprep.mubr.msk.f32.mxu0 %vm4010_vm0, %v4009_v0 }
 0xf2e   : > { %v2034_v34 = vmul.f32 %v3732_v42, %v3724_v55 }
 0xf2f   : > { %v2279_v44 = vpop.permute.xlu0 %2278 }
 0xf30   : > { %3446 = vmatmul.mubr.msk.f32.vlgmr.msra.gmra.mxu1 %vm955_vm5, %v2034_v34 }
 0xf31   : > { %v3734_v56 = vpop.eup %3733  ;;  %3470 = vmatpush3.msra.mxu1 %v2283_v31  ;;  %3448 = vmatprep.mubr.msk.f32.mxu1 %vm4010_vm0, %v4009_v0 }
 0xf32   : > { %3471 = vmatprep.subr.mxu1 %v4009_v0  ;;  %v2035_v43 = vmul.f32 %v3734_v56, %v3726_v24 }
 0xf33   : > { %3472 = vmatpush3.msra.mxu1 %v2281_v35 }
 0xf34   : > { %3473 = vmatprep.subr.mxu1 %v4009_v0  ;;  %3449 = vmatmul.mubr.msk.f32.gmra.mxu1 %vm955_vm5, %v2035_v43 }
 0xf35   : > { %v3736_v12 = vpop.eup %3735  ;;  %3474 = vmatpush3.msra.mxu1 %v2279_v44  ;;  %3451 = vmatprep.mubr.msk.f32.mxu1 %vm4010_vm0, %v4009_v0 }
 0xf36   : > { %v2036_v45 = vmul.f32 %v3736_v12, %v3728_v26  ;;  %3501 = vmatprep.subr.mxu1 %v4009_v0  ;;  %v3103_v12 = vld [vmem:[%s5017_s8 + $0x38] sm:$0xff] }
 0xf38   : > { %3452 = vmatmul.mubr.msk.f32.gmra.mxu1 %vm955_vm5, %v2036_v45  ;;  %v3102_v45 = vld [vmem:[%s5017_s8 + $0x30] sm:$0xff] }
 0xf39   : > { %v3738_v17 = vpop.eup %3737  ;;  %3475 = vmatprep.mubr.msk.f32.mxu1 %vm4010_vm0, %v4009_v0 }
 0xf3a   : > { %v2275_v46 = vmul.f32 %v3738_v17, %v3730_v29  ;;  %v4825_v29 = vld [vmem:[#allocation8 + $0x1] ss:$0 sm:$0xff]  ;;  %v3101_v17 = vld [vmem:[%s5017_s8 + $0x28] sm:$0xff] }
 0xf3c   : > { %3476 = vmatmul.mubr.msk.f32.vlgmr.msra.gmra.mxu1 %vm955_vm5, %v2275_v46  ;;  %v3100_v46 = vld [vmem:[%s5017_s8 + $0x20] sm:$0xff] }
 0xf3d   : > { %3478 = vmatprep.mubr.msk.f32.mxu1 %vm4010_vm0, %v4009_v0  ;;  %3502 = vmatpush3.msra.mxu1 %v3103_v12 }
 0xf3e   : > { %3503 = vmatprep.subr.mxu1 %v4009_v0 }
 0xf3f   : > { %3504 = vmatpush3.msra.mxu1 %v3102_v45 }
 0xf40   : > { %3505 = vmatprep.subr.mxu1 %v4009_v0 }
 0xf41   : > { %3506 = vmatpush3.msra.mxu1 %v3101_v17 }
 0xf42   : > { %3507 = vmatprep.subr.mxu1 %v4009_v0 }
 0xf43   : > { %3508 = vmatpush3.msra.mxu1 %v3100_v46 }
 0xf44   : > { %3543 = vmatprep.subr.mxu1 %v4009_v0 }
 0xf4f   : > { %v2230_v47 = vpop.f32.mrf.mxu0 }
 0xf50   : > { %v2240_v48 = vmul.f32 0.25, %v2230_v47 }
 0xf51   : > { %v3465_v49 = vpop.f32.mrf.mxu0 }
 0xf52   : > { %v2243_v50 = vadd.f32 %v2240_v48, %v4450_v33 }
 0xf54   : > { %v2248_v51 = vsel %vm955_vm5, %v2243_v50, -inf }
 0xf55   : > { %2249 = vmax.xlane.f32.xlu1 %v2248_v51 }
 0xfde   : > { %v2250_v5 = vpop.xlane.xlu1 %2249 }
 0xfdf   : > { %v2255_v6 = vsub.f32 %v2243_v50, %v2250_v5  ;;  %v3111_v5 = vld [vmem:[%s5019_s10 + $0x58] sm:$0xff] }
 0xfe1   : > { %v2259_v7 = vmul.f32 1.442695, %v2255_v6  ;;  %v3110_v6 = vld [vmem:[%s5019_s10 + $0x50] sm:$0xff] }
 0xfe3   : > { %3739 = vpow2.f32 %v2259_v7  ;;  %v3109_v7 = vld [vmem:[%s5019_s10 + $0x48] sm:$0xff] }
 0xfec   : > { %v2235_v18 = vpop.f32.mrf.mxu0 }
 0xfed   : > { %v2241_v8 = vmul.f32 0.25, %v2235_v18 }
 0xfee   : > { %v3468_v54 = vpop.f32.mrf.mxu0 }
 0xfef   : > { %v2244_v9 = vadd.f32 %v2241_v8, %v4450_v33  ;;  %v3108_v8 = vld [vmem:[%s5019_s10 + $0x40] sm:$0xff] }
 0xff0   : > { %v2121_v58 = vpop.f32.mrf.mxu1  ;;  %v3740_v11 = vpop.eup %3739 }
 0xff1   : > { %v2251_v10 = vsel %vm955_vm5, %v2244_v9, -inf  ;;  %v2266_v16 = vsel %vm955_vm5, %v3740_v11, 0.0 }
 0xff2   : > { %v3447_v60 = vpop.f32.mrf.mxu1 }
 0xff4   : > { %v4809_v61 = vpop.f32.mrf.mxu1 }
 0xff6   : > { %v3450_v62 = vpop.f32.mrf.mxu1 }
 0xff8   : > { %v4811_v63 = vpop.f32.mrf.mxu1 }
 0xffa   : > { %v3453_v1 = vpop.f32.mrf.mxu1 }
 0xffc   : > { %v2362_v2 = vpop.f32.mrf.mxu1 }
 0xffd   : > { %2379 = vrot.lane.b32.xlu0 %v2362_v2, %s4017_s28  ;;  %v3115_v2 = vld [vmem:[%s5019_s10 + $0x78] sm:$0xff] }
 0xffe   : > { %v3477_v3 = vpop.f32.mrf.mxu1 }
 0xfff   : > { %v3112_v3 = vld [vmem:[%s5019_s10 + $0x60] sm:$0xff] }
0x101c   : > { %2252 = vmax.xlane.f32.xlu0 %v2251_v10 }
0x1020   : > { %2267 = vadd.xlane.f32.xlu0 %v2266_v16 }
0x106f   : > { %v2380_v20 = vpop.permute.xlu0 %2379 }
0x1070   : > { %v2388_v21 = vsel %vm856_vm3, %v2121_v58, %v2380_v20  ;;  %v4869_v58 = vrot.slane %v4672_v4, %v1497_v15 }
0x1071   : > { %3493 = vmatmul.mubr.msk.f32.vlgmr.msra.gmra.mxu0 %vm692_vm2, %v2388_v21 }
0x1072   : > { %3495 = vmatprep.mubr.msk.f32.mxu0 %vm4010_vm0, %v4009_v0  ;;  %3519 = vmatpush3.msra.mxu0 %v3115_v2 }
0x1073   : > { %3520 = vmatprep.subr.mxu0 %v4009_v0 }
0x10a5   : > { %v2253_v23 = vpop.xlane.xlu0 %2252 }
0x10a6   : > { %v2256_v19 = vsub.f32 %v2244_v9, %v2253_v23  ;;  %v4915_v9 = vld [vmem:[#allocation10 + $0x1] ss:$0 sm:$0xff] }
0x10a8   : > { %v2261_v55 = vmul.f32 1.442695, %v2256_v19 }
0x10a9   : > { %v2268_v57 = vpop.xlane.xlu0 %2267 }
0x10aa   : > { %3741 = vpow2.f32 %v2261_v55 }
0x10ab   : > { %3743 = vrcp.f32 %v2268_v57 }
0x10b7   : > { %v3742_v33 = vpop.eup %3741 }
0x10b8   : > { %v3744_v24 = vpop.eup %3743  ;;  %v2269_v25 = vsel %vm955_vm5, %v3742_v33, 0.0 }
0x10b9   : > { %2270 = vadd.xlane.f32.xlu1 %v2269_v25  ;;  %v2276_v26 = vmul.f32 %v3744_v24, %v3740_v11 }
0x10bb   : > { %3479 = vmatmul.mubr.msk.f32.gmra.mxu1 %vm955_vm5, %v2276_v26 }
0x10bc   : > { %3481 = vmatprep.mubr.msk.f32.mxu1 %vm4010_vm0, %v4009_v0 }
0x1131   : > { %v2471_v27 = vpop.f32.mrf.mxu0 }
0x1132   : > { %v2485_v30 = vadd.f32 %v2471_v27, %v4636_v28 }
0x1133   : > { %v3494_v31 = vpop.f32.mrf.mxu0 }
0x1134   : > { %v4829_v35 = vadd.f32 %v4825_v29, %v2485_v30 }
0x1136   : > { %v2499_v37 = vsel %vm692_vm2, %v4829_v35, 0.0 }
0x1137   : > { %2500 = vadd.xlane.f32.xlu0 %v2499_v37 }
0x1142   : > { %v2271_v36 = vpop.xlane.xlu1 %2270 }
0x1143   : > { %3745 = vrcp.f32 %v2271_v36 }
0x1150   : > { %v3746_v41 = vpop.eup %3745 }
0x1151   : > { %v2277_v39 = vmul.f32 %v3746_v41, %v3742_v33 }
0x1153   : > { %3482 = vmatmul.mubr.msk.f32.gmra.mxu1 %vm955_vm5, %v2277_v39 }
0x1154   : > { %3509 = vmatprep.mubr.msk.f32.mxu1 %vm4010_vm0, %v4009_v0 }
0x117b   : > { %v2367_v40 = vpop.f32.mrf.mxu1 }
0x117c   : > { %2381 = vrot.lane.b32.xlu0 %v2367_v40, %s4017_s28 }
0x117d   : > { %v3480_v28 = vpop.f32.mrf.mxu1 }
0x11c0   : > { %v2501_v42 = vpop.xlane.xlu0 %2500 }
0x11c1   : > { %v2508_v34 = vmul.f32 0.03125, %v2501_v42 }
0x11c3   : > { %v2511_v56 = vsub.f32 %v4829_v35, %v2508_v34 }
0x11c5   : > { %v2514_v43 = vmul.f32 %v2511_v56, %v2511_v56 }
0x11c7   : > { %v2517_v44 = vsel %vm692_vm2, %v2514_v43, 0.0 }
0x11c8   : > { %2518 = vadd.xlane.f32.xlu1 %v2517_v44 }
0x11ee   : > { %v2382_v47 = vpop.permute.xlu0 %2381 }
0x11ef   : > { %v2389_v48 = vsel %vm856_vm3, %v4809_v61, %v2382_v47 }
0x11f0   : > { %3496 = vmatmul.mubr.msk.f32.gmra.mxu0 %vm692_vm2, %v2389_v48 }
0x11f1   : > { %3498 = vmatprep.mubr.msk.f32.mxu0 %vm4010_vm0, %v4009_v0 }
0x1213   : > { %v2372_v49 = vpop.f32.mrf.mxu1 }
0x1214   : > { %2383 = vrot.lane.b32.xlu1 %v2372_v49, %s4017_s28  ;;  %v3119_v49 = vld [vmem:[#allocation11 + $0x1] ss:$0 sm:$0xff] }
0x1215   : > { %v3483_v50 = vpop.f32.mrf.mxu1 }
0x1251   : > { %v2519_v51 = vpop.xlane.xlu1 %2518 }
0x1252   : > { %v2526_v22 = vmul.f32 0.03125, %v2519_v51 }
0x1254   : > { %v2529_v52 = vadd.f32 1e-12, %v2526_v22 }
0x1256   : > { %3747 = vrsqrt.f32 %v2529_v52 }
0x1263   : > { %v3748_v18 = vpop.eup %3747 }
0x1264   : > { %v2535_v54 = vmul.f32 %v3748_v18, %v2511_v56 }
0x1266   : > { %v2542_v59 = vmul.f32 %v4864_v14, %v2535_v54 }
0x1268   : > { %v2549_v60 = vadd.f32 %v4869_v58, %v2542_v59 }
0x126a   : > { %3510 = vmatmul.mubr.msk.f32.vlgmr.msra.gmra.mxu1 %vm692_vm2, %v2549_v60 }
0x126b   : > { %3512 = vmatprep.mubr.msk.f32.mxu1 %vm4010_vm0, %v4009_v0 }
0x1286   : > { %v2384_v61 = vpop.permute.xlu1 %2383 }
0x1287   : > { %v2390_v13 = vsel %vm856_vm3, %v4811_v63, %v2384_v61  ;;  %v3114_v63 = vld [vmem:[%s5019_s10 + $0x70] sm:$0xff] }
0x1288   : > { %3499 = vmatmul.mubr.msk.f32.gmra.mxu0 %vm692_vm2, %v2390_v13 }
0x1289   : > { %3534 = vmatprep.mubr.msk.f32.mxu0 %vm4010_vm0, %v4009_v0  ;;  %3521 = vmatpush3.msra.mxu0 %v3114_v63 }
0x128a   : > { %3522 = vmatprep.subr.mxu0 %v4009_v0 }
0x12b0   : > { %v2476_v53 = vpop.f32.mrf.mxu0 }
0x12b1   : > { %v2486_v15 = vadd.f32 %v2476_v53, %v4641_v32  ;;  %v3113_v32 = vld [vmem:[%s5019_s10 + $0x68] sm:$0xff] }
0x12b2   : > { %v3497_v4 = vpop.f32.mrf.mxu0  ;;  %3523 = vmatpush3.msra.mxu0 %v3113_v32 }
0x12b3   : > { %v2497_v62 = vadd.f32 %v4825_v29, %v2486_v15  ;;  %3524 = vmatprep.subr.mxu0 %v4009_v0 }
0x12b4   : > { %3525 = vmatpush3.msra.mxu0 %v3112_v3 }
0x12b5   : > { %v2502_v1 = vsel %vm692_vm2, %v2497_v62, 0.0  ;;  %3526 = vmatprep.subr.mxu0 %v4009_v0 }
0x12b6   : > { %2503 = vadd.xlane.f32.xlu1 %v2502_v1  ;;  %3527 = vmatpush3.msra.mxu0 %v3111_v5 }
0x12b7   : > { %3528 = vmatprep.subr.mxu0 %v4009_v0 }
0x12b8   : > { %3529 = vmatpush3.msra.mxu0 %v3110_v6 }
0x12b9   : > { %3530 = vmatprep.subr.mxu0 %v4009_v0 }
0x12ba   : > { %3531 = vmatpush3.msra.mxu0 %v3109_v7  ;;  %v2809_v7 = vld [vmem:[%s5022_s13 + $0x10] sm:$0xff] }
0x12bb   : > { %3532 = vmatprep.subr.mxu0 %v4009_v0 }
0x12bc   : > { %3533 = vmatpush3.msra.mxu0 %v3108_v8  ;;  %v2808_v8 = vld [vmem:[%s5022_s13 + $0x8] sm:$0xff] }
0x132a   : > { %v2640_v10 = vpop.f32.mrf.mxu1 }
0x132b   : > { %v2641_v11 = vadd.f32 %v4915_v9, %v2640_v10 }
0x132c   : > { %v3511_v16 = vpop.f32.mrf.mxu1 }
0x132d   : > { %v2657_v20 = vmul.f32 0.044715, %v2641_v11  ;;  %v2654_v24 = vmul.f32 0.5, %v2641_v11 }
0x132f   : > { %v2660_v21 = vmul.f32 %v2657_v20, %v2641_v11 }
0x1331   : > { %v2663_v23 = vmul.f32 %v2660_v21, %v2641_v11 }
0x1333   : > { %v2666_v19 = vadd.f32 %v2663_v23, %v2641_v11  ;;  %v2807_v11 = vld [vmem:[%s5022_s13] sm:$0xff] }
0x1335   : > { %v2669_v55 = vmul.f32 0.7978846, %v2666_v19 }
0x1337   : > { %3749 = vtanh.f32 %v2669_v55 }
0x133f   : > { %v2504_v57 = vpop.xlane.xlu1 %2503 }
0x1340   : > { %v2509_v26 = vmul.f32 0.03125, %v2504_v57 }
0x1342   : > { %v2512_v31 = vsub.f32 %v2497_v62, %v2509_v26 }
0x1344   : > { %v3750_v33 = vpop.eup %3749  ;;  %v2515_v40 = vmul.f32 %v2512_v31, %v2512_v31 }
0x1345   : > { %v2675_v25 = vadd.f32 1.0, %v3750_v33  ;;  %v2787_v33 = vld [vmem:[%s5069_s9] sm:$0x3]  ;;  %s3925_s9 = scalar_lea.vmem %s3924_s24, 32 }
0x1346   : > { %v2520_v28 = vsel %vm692_vm2, %v2515_v40, 0.0  ;;  %p3927_p9 = scmp.lt.s32.totalorder %s3925_s9, %s3919_s3 }
0x1347   : > { %v2678_v27 = vmul.f32 %v2675_v25, %v2654_v24  ;;  %v2804_v25 = vrot.slane %v2787_v33, 1 }
0x1348   : > { %v2481_v30 = vpop.f32.mrf.mxu0  ;;  %p3928_p1 = por %p3927_p9, %p3926_p7 }
0x1349   : > { %v2487_v37 = vadd.f32 %v2481_v30, %v4646_v38  ;;  %3535 = vmatmul.mubr.msk.f32.vlgmr.msra.gmra.mxu0 %vm1637_vm6, %v2678_v27 }
0x134a   : > { %v3500_v36 = vpop.f32.mrf.mxu0  ;;  %3537 = vmatprep.mubr.msk.f32.mxu0 %vm4010_vm0, %v4009_v0  ;;  %p3929_p3 = pnand %p3928_p1, %p3922_p13 }
0x134b   : > { %v2498_v41 = vadd.f32 %v4825_v29, %v2487_v37 }
0x134d   : > { %v2505_v39 = vsel %vm692_vm2, %v2498_v41, 0.0 }
0x134e   : > { %2506 = vadd.xlane.f32.xlu0 %v2505_v39 }
0x1352   : > { %2521 = vadd.xlane.f32.xlu0 %v2520_v28 }
0x13d7   : > { %v2507_v42 = vpop.xlane.xlu0 %2506 }
0x13d8   : > { %v2510_v34 = vmul.f32 0.03125, %v2507_v42 }
0x13da   : > { %v2513_v56 = vsub.f32 %v2498_v41, %v2510_v34 }
0x13db   : > { %v2522_v43 = vpop.xlane.xlu0 %2521 }
0x13dc   : > { %v2527_v38 = vmul.f32 0.03125, %v2522_v43  ;;  %v2516_v44 = vmul.f32 %v2513_v56, %v2513_v56 }
0x13de   : > { %v2530_v12 = vadd.f32 1e-12, %v2527_v38  ;;  %v2523_v45 = vsel %vm692_vm2, %v2516_v44, 0.0  ;;  %v2811_v44 = vld [vmem:[%s5070_s14] sm:$0x1] }
0x13df   : > { %2524 = vadd.xlane.f32.xlu1 %v2523_v45 }
0x13e0   : > { %3751 = vrsqrt.f32 %v2530_v12 }
0x13ed   : > { %v3752_v17 = vpop.eup %3751 }
0x13ee   : > { %v2536_v29 = vmul.f32 %v3752_v17, %v2512_v31 }
0x13f0   : > { %v2543_v46 = vmul.f32 %v4864_v14, %v2536_v29 }
0x13f2   : > { %v2550_v47 = vadd.f32 %v4869_v58, %v2543_v46 }
0x13f4   : > { %3513 = vmatmul.mubr.msk.f32.gmra.mxu1 %vm692_vm2, %v2550_v47 }
0x13f5   : > { %3515 = vmatprep.mubr.msk.f32.mxu1 %vm4010_vm0, %v4009_v0 }
0x1409   : > { %v2765_v48 = vpop.f32.mrf.mxu0 }
0x140a   : > { %v2777_v50 = vadd.f32 %v2765_v48, %v4829_v35 }
0x140b   : > { %v3536_v51 = vpop.f32.mrf.mxu0 }
0x140c   : > { %v2786_v22 = vadd.f32 %v3119_v49, %v2777_v50 }
0x140e   : > { %v2789_v52 = vsel %vm2788_vm7, %v2786_v22, 0.0 }
0x140f   : > { %2790 = vadd.xlane.f32.xlu0 %v2789_v52 }
0x1468   : > { %v2525_v18 = vpop.xlane.xlu1 %2524 }
0x1469   : > { %v2528_v54 = vmul.f32 0.03125, %v2525_v18 }
0x146b   : > { %v2531_v59 = vadd.f32 1e-12, %v2528_v54 }
0x146d   : > { %3753 = vrsqrt.f32 %v2531_v59 }
0x147a   : > { %v3754_v60 = vpop.eup %3753 }
0x147b   : > { %v2537_v61 = vmul.f32 %v3754_v60, %v2513_v56 }
0x147d   : > { %v2544_v13 = vmul.f32 %v4864_v14, %v2537_v61 }
0x147f   : > { %v2551_v53 = vadd.f32 %v4869_v58, %v2544_v13  ;;  %v2810_v58 = vld [vmem:[%s5022_s13 + $0x18] sm:$0xff] }
0x1480   : > { %3544 = vmatpush3.msra.mxu1 %v2810_v58 }
0x1481   : > { %3516 = vmatmul.mubr.msk.f32.gmra.mxu1 %vm692_vm2, %v2551_v53  ;;  %3545 = vmatprep.subr.mxu1 %v4009_v0 }
0x1482   : > { %3551 = vmatprep.mubr.msk.f32.mxu1 %vm4010_vm0, %v4009_v0  ;;  %3546 = vmatpush3.msra.mxu1 %v2809_v7 }
0x1483   : > { %3547 = vmatprep.subr.mxu1 %v4009_v0 }
0x1484   : > { %3548 = vmatpush3.msra.mxu1 %v2808_v8 }
0x1485   : > { %3549 = vmatprep.subr.mxu1 %v4009_v0 }
0x1486   : > { %3550 = vmatpush3.msra.mxu1 %v2807_v11 }
0x1498   : > { %v2791_v35 = vpop.xlane.xlu0 %2790 }
0x1499   : > { %v2792_v15 = vmul.f32 0.03125, %v2791_v35 }
0x149b   : > { %v2793_v4 = vsub.f32 %v2786_v22, %v2792_v15 }
0x149d   : > { %v2794_v62 = vmul.f32 %v2793_v4, %v2793_v4 }
0x149f   : > { %v2795_v1 = vsel %vm2788_vm7, %v2794_v62, 0.0 }
0x14a0   : > { %2796 = vadd.xlane.f32.xlu1 %v2795_v1 }
0x14b4   : > { %v2645_v2 = vpop.f32.mrf.mxu1 }
0x14b5   : > { %v2646_v63 = vadd.f32 %v4915_v9, %v2645_v2 }
0x14b6   : > { %v3514_v32 = vpop.f32.mrf.mxu1 }
0x14b7   : > { %v2658_v3 = vmul.f32 0.044715, %v2646_v63  ;;  %v2655_v20 = vmul.f32 0.5, %v2646_v63 }
0x14b9   : > { %v2661_v14 = vmul.f32 %v2658_v3, %v2646_v63 }
0x14bb   : > { %v2664_v5 = vmul.f32 %v2661_v14, %v2646_v63 }
0x14bd   : > { %v2667_v6 = vadd.f32 %v2664_v5, %v2646_v63 }
0x14bf   : > { %v2670_v10 = vmul.f32 0.7978846, %v2667_v6 }
0x14c1   : > { %3755 = vtanh.f32 %v2670_v10 }
0x14ce   : > { %v3756_v16 = vpop.eup %3755 }
0x14cf   : > { %v2676_v21 = vadd.f32 1.0, %v3756_v16 }
0x14d1   : > { %v2679_v23 = vmul.f32 %v2676_v21, %v2655_v20 }
0x14d3   : > { %3538 = vmatmul.mubr.msk.f32.gmra.mxu0 %vm1637_vm6, %v2679_v23 }
0x14d4   : > { %3540 = vmatprep.mubr.msk.f32.mxu0 %vm4010_vm0, %v4009_v0 }
0x1529   : > { %v2797_v19 = vpop.xlane.xlu1 %2796 }
0x152a   : > { %v2798_v55 = vmul.f32 0.03125, %v2797_v19 }
0x152c   : > { %v2799_v57 = vadd.f32 1e-12, %v2798_v55 }
0x152e   : > { %3757 = vrsqrt.f32 %v2799_v57 }
0x153b   : > { %v3758_v24 = vpop.eup %3757 }
0x153c   : > { %v2801_v26 = vmul.f32 %v3758_v24, %v2793_v4 }
0x153e   : > { %v2802_v27 = vmul.f32 %v2801_v26, %v2787_v33 }
0x1540   : > { %v2806_v30 = vadd.f32 %v2804_v25, %v2802_v27 }
0x1541   : > { %v2650_v31 = vpop.f32.mrf.mxu1 }
0x1542   : > { %v2651_v37 = vadd.f32 %v4915_v9, %v2650_v31  ;;  %3552 = vmatmul.mubr.msk.f32.vlgmr.msra.gmra.mxu1 %vm692_vm2, %v2806_v30 }
0x1543   : > { %v3517_v0 = vpop.f32.mrf.mxu1 }
0x1544   : > { %v2659_v36 = vmul.f32 0.044715, %v2651_v37  ;;  %v2656_v34 = vmul.f32 0.5, %v2651_v37 }
0x1546   : > { %v2662_v41 = vmul.f32 %v2659_v36, %v2651_v37 }
0x1548   : > { %v2665_v39 = vmul.f32 %v2662_v41, %v2651_v37 }
0x154a   : > { %v2668_v40 = vadd.f32 %v2665_v39, %v2651_v37 }
0x154c   : > { %v2671_v28 = vmul.f32 0.7978846, %v2668_v40 }
0x154e   : > { %3759 = vtanh.f32 %v2671_v28 }
0x155b   : > { %v3760_v42 = vpop.eup %3759 }
0x155c   : > { %v2677_v56 = vadd.f32 1.0, %v3760_v42 }
0x155e   : > { %v2680_v43 = vmul.f32 %v2677_v56, %v2656_v34 }
0x1560   : > { %3541 = vmatmul.mubr.msk.f32.gmra.mxu0 %vm1637_vm6, %v2680_v43 }
0x1593   : > { %v2770_v9 = vpop.f32.mrf.mxu0 }
0x1595   : > { %v3539_v38 = vpop.f32.mrf.mxu0 }
0x1602   : > { %v2881_v12 = vpop.f32.mrf.mxu1 }
0x1603   : > { %v2882_v45 = vadd.f32 %v2881_v12, %v2811_v44 }
0x1604   : > { %v3553_v17 = vpop.f32.mrf.mxu1 }
0x1605   : > { %2885 = vst [vmem:[%s584_s7] sm:$0x1] %v2882_v45 }
0x1606   : > { %3932 = shalt.err (!%p3929_p3)
}
0x1607   : > { %s3933_s23 = scalar_lea.hbm %s4972_s22, 16  ;;  %s3937_s14 = scalar_lea.hbm %s5071_s15, 32 }
0x1608   : > { %p3934_p4 = scmp.ne.s32.totalorder %s4972_s22, %s3933_s23  ;;  %p3938_p2 = scmp.lt.s32.totalorder %s4972_s22, %s5071_s15 }
0x1609   : > { %p3939_p5 = scmp.lt.s32.totalorder %s3937_s14, %s3933_s23 }
0x160a   : > { %p3935_p12 = pnand %p3934_p4, %p5072_p11 }
0x160b   : > { %p3940_p8 = por %p3939_p5, %p3938_p2 }
0x160c   : > { %p3936_p6 = pneg %p3935_p12 }
0x160e   : > { %p3941_p10 = pnand %p3940_p8, %p3936_p6 }
0x1610   : > { %3944 = shalt.err (!%p3941_p10)
}
0x1611   : > { %3585 = dma.vmem_to_hbm [thread:$0]  (%p5072_p11), %s2900_s25, 16, %s4972_s22, %s2887_s29  }
0x1620   : > { %v2774_v29 = vpop.f32.mrf.mxu0 }
0x1622   : > { %v3542_v46 = vpop.f32.mrf.mxu0 }
0x1623 PF: > { %s2911_s30 = sand.u32 1, %s3983_s18   ;;  %p5073_p0 = scmp.ne.s32.totalorder %s5057_s2, 0 }
0x1624   : > { %p5074_p13 = scmp.ge.s32.totalorder %s3995_s21, 2  ;;  %s2912_s26 = scalar_lea.sflag [#allocation4], %s2911_s30 }
0x1626   : > { %p3608_p7 = pnand %p5074_p13, %p5073_p0 }
0x1628   : > { %p3609_p9 = pneg %p3608_p7 }
0x162a   : > { %3978 = dma.done.wait (%p3609_p9), %s2912_s26, 16  }
0x162b   : > { %3980 = vsyncadd (%p3609_p9), %s2912_s26, 4294967280  ;;  %s5075_s17 = sld [smem:[#allocation19_spill]]  ;;  %p31_p11 = scmp.ge.s32.totalorder %s4203_s16, 4  }
0x162c   : > { %s5076_s18 = smov %s3987_s19  ;;  %s5077_s19 = smov %s3991_s20 }
0x162d   : > { %s5079_s21 = smov %s4203_s16  ;;  %33 = sbr.rel (!%p31_p11) target bundleno = 17 (0x11), region = 154 }
0x1631   : > { %s5078_s20 = smov %s5075_s17 }
0x1632   :  { %2916 = vsyncpa [#allocation3], 1 }
0x1633   :  { %2918 = vsyncpa [#allocation3 + $0x1], 1 }
0x1634   :  { %2919 = vsyncpa [#allocation6], 1 }
0x1635   :  { %2920 = vsyncpa [#allocation9], 1 }
0x1636   :  { %2921 = vsyncpa [#allocation12], 1 }
0x1637   :  { %2922 = vsyncpa [#allocation4], 1 }
0x1638   :  { %2924 = vsyncpa [#allocation4 + $0x1], 1 }

</bundles_post_ra>
